<compile_context>
chip_gen: v5e
topology: v5e:2x2
jax: 0.10.0
libtpu: 0.0.40
codegen_flags: <defaults>
</compile_context>

<pallas_src>
import math
import functools

import jax
import jax.numpy as jnp
from jax import lax
from jax.experimental import pallas as pl
from jax.experimental.pallas import tpu as pltpu


# ----------------------------- shared math helpers -----------------------------

def _layer_norm(x, gamma, beta, eps=1e-5):
    mu = jnp.mean(x, axis=-1, keepdims=True)
    var = jnp.mean((x - mu) ** 2, axis=-1, keepdims=True)
    return (x - mu) * lax.rsqrt(var + eps) * gamma + beta


# ----------------------------- positional encoding table -----------------------------

def make_pe(max_len, d_model):
    position = jnp.arange(max_len, dtype=jnp.float32)[:, None]
    div = jnp.exp(jnp.arange(0, d_model, 2, dtype=jnp.float32)
                  * (-math.log(10000.0) / d_model))
    pe = jnp.zeros((max_len, d_model), jnp.float32)
    pe = pe.at[:, 0::2].set(jnp.sin(position * div))
    pe = pe.at[:, 1::2].set(jnp.cos(position * div))
    return pe


# ----------------------------- fused transformer kernel -----------------------------

def _fused_transformer_kernel(x_ref, pe_ref, mask_ref,
                              wqkv_ref, wo_ref, w1_ref, w2_ref, vec_ref,
                              o_ref,
                              h_ref,                       # VMEM scratch: resident activation
                              *, nhead, bt, seq):
    l = pl.program_id(1)
    M, D = h_ref.shape                                     # M = bt * seq
    FF = w1_ref.shape[1]
    dh = D // nhead

    # Layer 0: fused positional-encoding add; activation becomes VMEM-resident.
    @pl.when(l == 0)
    def _():
        h_ref[...] = x_ref[...] + pe_ref[...]

    x = h_ref[...]                                         # (M, D) f32
    xb = x.astype(jnp.bfloat16)

    # Packed per-layer vectors: one (8, maxW) slab -> (1, width) row slices.
    vec = vec_ref[...]
    bqkv = vec[0:1, :3 * D]
    bo   = vec[1:2, :D]
    b1   = vec[2:3, :FF]
    b2   = vec[3:4, :D]
    g1   = vec[4:5, :D]
    be1  = vec[5:6, :D]
    g2   = vec[6:7, :D]
    be2  = vec[7:8, :D]

    # --- multi-head self attention (dropout = identity) ---
    # Fused QKV projection on the whole (bt*seq, D) slab.  1/sqrt(dh) is pre-folded
    # into the Q columns of wqkv/bqkv at packing time.
    qkv = jnp.dot(xb, wqkv_ref[...], preferred_element_type=jnp.float32) + bqkv   # (M, 3D)

    mask = mask_ref[...]                                   # (bt, 1, seq) additive 0 / -1e9
    wo = wo_ref[...]                                       # (D, D) bf16

    attn = None
    for h in range(nhead):
        # Lane slices of the QKV slab; tile-aligned leading-dim reshape to (bt, seq, dh).
        q = qkv[:, h * dh:(h + 1) * dh].reshape(bt, seq, dh).astype(jnp.bfloat16)
        k = qkv[:, D + h * dh:D + (h + 1) * dh].reshape(bt, seq, dh).astype(jnp.bfloat16)
        v = qkv[:, 2 * D + h * dh:2 * D + (h + 1) * dh].reshape(bt, seq, dh).astype(jnp.bfloat16)

        s = jnp.einsum('bqd,bkd->bqk', q, k,
                       preferred_element_type=jnp.float32) + mask                 # (bt,S,S) f32
        s = s - jnp.max(s, axis=-1, keepdims=True)
        p = jnp.exp(s)
        p = p * pl.reciprocal(jnp.sum(p, axis=-1, keepdims=True), approx=True)
        oh = jnp.einsum('bqk,bkd->bqd', p.astype(jnp.bfloat16), v,
                        preferred_element_type=jnp.float32)                       # (bt,S,dh)

        # Head concat folded into the out-projection: sum_h oh_h @ wo[h*dh:(h+1)*dh, :]
        part = jnp.dot(oh.reshape(M, dh).astype(jnp.bfloat16),
                       wo[h * dh:(h + 1) * dh, :],
                       preferred_element_type=jnp.float32)                        # (M, D)
        attn = part if attn is None else attn + part
    attn = attn + bo

    # residual + LayerNorm (post-norm, norm_first=False), f32
    x = _layer_norm(x + attn, g1, be1)

    # --- position-wise feed-forward (ReLU) ---
    ff = jnp.dot(x.astype(jnp.bfloat16), w1_ref[...],
                 preferred_element_type=jnp.float32) + b1
    ff = jnp.maximum(ff, 0.0)
    ff = jnp.dot(ff.astype(jnp.bfloat16), w2_ref[...],
                 preferred_element_type=jnp.float32) + b2

    x = _layer_norm(x + ff, g2, be2)
    h_ref[...] = x                                         # stays resident for next layer

    @pl.when(l == pl.num_programs(1) - 1)
    def _():
        # TODO(synk): emit bf16 here if downstream accepts it (halves the writeback).
        o_ref[...] = x.astype(o_ref.dtype)


# ----------------------------- wrapper -----------------------------

def temporal_transformer(x, padding_mask, kparams, pe, nhead, batch_tile=None):
    B, S, D = x.shape
    L = kparams['wqkv'].shape[0]
    FF = kparams['w1'].shape[2]
    maxW = kparams['vecs'].shape[2]

    if batch_tile is None:
        # Largest divisor of B keeping the matmul M-dim (Bt*S) near the 256-row MXU sweet
        # spot (v6e/v7x; v5e wants >=128).  On v7x also prefer an even number of batch
        # tiles so both TensorCores get work.
        batch_tile = 1
        for bt in range(1, B + 1):
            if B % bt == 0 and bt * S <= 256:
                batch_tile = bt
    Bt = batch_tile
    nb = B // Bt
    M = Bt * S

    # PyTorch src_key_padding_mask: True = ignore this key -> additive -1e9.
    add_mask = jnp.where(padding_mask, -1e9, 0.0).astype(jnp.float32).reshape(B, 1, S)
    # PE replicated across the Bt sequences of a tile (host-side, free) -> resident block.
    pe_tile = jnp.tile(pe[:S].astype(jnp.float32), (Bt, 1))          # (Bt*S, D)
    x2d = x.reshape(B * S, D)                                        # flattened rows

    def w_spec(a):        # stacked per-layer weights, indexed by the layer axis
        nd = a.ndim - 1
        return pl.BlockSpec((None,) + a.shape[1:],
                            lambda b, l, _nd=nd: (l,) + (0,) * _nd)

    in_specs = [
        pl.BlockSpec((M, D), lambda b, l: (b, 0)),          # x (only consumed at l==0)
        pl.BlockSpec((M, D), lambda b, l: (0, 0)),          # pe (resident)
        pl.BlockSpec((Bt, 1, S), lambda b, l: (b, 0, 0)),   # additive key-padding mask
        w_spec(kparams['wqkv']), w_spec(kparams['wo']),
        w_spec(kparams['w1']), w_spec(kparams['w2']),
        w_spec(kparams['vecs']),
    ]

    # Explicit VMEM budget: resident activation + double-buffered I/O blocks +
    # 2x per-layer weights + activation intermediates, with headroom.
    f32b, bf16b = 4, 2
    act_bytes = M * D * f32b
    io_bytes = 2 * (M * D * x.dtype.itemsize            # x block
                    + M * D * x.dtype.itemsize          # out block
                    + M * D * f32b                      # pe
                    + Bt * S * f32b)                    # mask
    w_bytes = (D * 3 * D + D * D + D * FF + FF * D) * bf16b + 8 * maxW * f32b
    tmp_bytes = (M * 3 * D + M * FF + nhead * Bt * S * S + 4 * M * D) * f32b
    budget = act_bytes + io_bytes + 2 * w_bytes + tmp_bytes + (4 << 20)
    vmem_limit = int(min(100 << 20, max(32 << 20, budget)))

    kernel = functools.partial(_fused_transformer_kernel, nhead=nhead, bt=Bt, seq=S)
    out2d = pl.pallas_call(
        kernel,
        out_shape=jax.ShapeDtypeStruct((B * S, D), x.dtype),
        grid=(nb, L),
        in_specs=in_specs,
        out_specs=pl.BlockSpec((M, D), lambda b, l: (b, 0)),
        scratch_shapes=[pltpu.VMEM((M, D), jnp.float32)],
        compiler_params=pltpu.CompilerParams(
            dimension_semantics=("parallel", "arbitrary"),
            vmem_limit_bytes=vmem_limit),
    )(x2d, pe_tile, add_mask,
      kparams['wqkv'], kparams['wo'], kparams['w1'], kparams['w2'], kparams['vecs'])
    return out2d.reshape(B, S, D)


# ----------------------------- parameters -----------------------------

def init_params(key, num_layers, d_model, nhead, dim_ff):
    """Logical (PyTorch-orientation) per-layer params stacked along a leading layer axis."""
    sc = 0.05
    def layer(i):
        ks = jax.random.split(jax.random.fold_in(key, i), 8)
        return dict(
            wqkv=jax.random.normal(ks[0], (3 * d_model, d_model), jnp.float32) * sc,
            bqkv=jax.random.normal(ks[4], (3 * d_model,), jnp.float32) * sc,
            wo=jax.random.normal(ks[1], (d_model, d_model), jnp.float32) * sc,
            bo=jax.random.normal(ks[5], (d_model,), jnp.float32) * sc,
            w1=jax.random.normal(ks[2], (dim_ff, d_model), jnp.float32) * sc,
            b1=jax.random.normal(ks[6], (dim_ff,), jnp.float32) * sc,
            w2=jax.random.normal(ks[3], (d_model, dim_ff), jnp.float32) * sc,
            b2=jax.random.normal(ks[7], (d_model,), jnp.float32) * sc,
            g1=jnp.ones((d_model,), jnp.float32), be1=jnp.zeros((d_model,), jnp.float32),
            g2=jnp.ones((d_model,), jnp.float32), be2=jnp.zeros((d_model,), jnp.float32),
        )
    layers = [layer(i) for i in range(num_layers)]
    return {k: jnp.stack([lay[k] for lay in layers]) for k in layers[0]}


def pack_params(logical, nhead):
    """Kernel layout: (in, out) weight orientation, bf16 matmul operands, 1/sqrt(dh) folded
    into the Q columns, and the eight small vectors packed into one (L, 8, maxW) slab."""
    L, threeD, D = logical['wqkv'].shape
    dh = D // nhead
    scale = 1.0 / math.sqrt(dh)

    wqkv = jnp.swapaxes(logical['wqkv'], 1, 2)            # (L, D, 3D)
    wqkv = wqkv.at[:, :, :D].multiply(scale)              # fold attention scale into Q
    bqkv = logical['bqkv'].at[:, :D].multiply(scale)      # (L, 3D)
    wo = jnp.swapaxes(logical['wo'], 1, 2)                # (L, D, D)
    w1 = jnp.swapaxes(logical['w1'], 1, 2)                # (L, D, FF)
    w2 = jnp.swapaxes(logical['w2'], 1, 2)                # (L, FF, D)
    FF = w1.shape[2]

    maxW = max(3 * D, FF, D)
    pad = lambda v: jnp.pad(v, ((0, 0), (0, maxW - v.shape[1])))
    vecs = jnp.stack([pad(bqkv), pad(logical['bo']), pad(logical['b1']), pad(logical['b2']),
                      pad(logical['g1']), pad(logical['be1']),
                      pad(logical['g2']), pad(logical['be2'])], axis=1)   # (L, 8, maxW)

    return dict(
        wqkv=wqkv.astype(jnp.bfloat16),
        wo=wo.astype(jnp.bfloat16),
        w1=w1.astype(jnp.bfloat16),
        w2=w2.astype(jnp.bfloat16),
        vecs=vecs.astype(jnp.float32),
    )


# ----------------------------- pure-JAX reference (f32, logical params) -----------------------------

def reference(x, padding_mask, lp, pe, nhead):
    B, S, D = x.shape
    L = lp['wqkv'].shape[0]
    dh = D // nhead
    x = x + pe[:S][None]
    add = jnp.where(padding_mask, -1e9, 0.0)[:, None, None, :]          # (B,1,1,S)
    for l in range(L):
        qkv = x @ lp['wqkv'][l].T + lp['bqkv'][l]
        q, k, v = jnp.split(qkv, 3, axis=-1)
        hs = lambda t: t.reshape(B, S, nhead, dh).transpose(0, 2, 1, 3)
        qh, kh, vh = hs(q), hs(k), hs(v)
        s = jnp.einsum('bhqd,bhkd->bhqk', qh, kh) / math.sqrt(dh) + add
        p = jax.nn.softmax(s, axis=-1)
        o = jnp.einsum('bhqk,bhkd->bhqd', p, vh).transpose(0, 2, 1, 3).reshape(B, S, D)
        o = o @ lp['wo'][l].T + lp['bo'][l]
        x = _layer_norm(x + o, lp['g1'][l], lp['be1'][l])
        ff = jnp.maximum(x @ lp['w1'][l].T + lp['b1'][l], 0.0)
        ff = ff @ lp['w2'][l].T + lp['b2'][l]
        x = _layer_norm(x + ff, lp['g2'][l], lp['be2'][l])
    return x


# ----------------------------- main -----------------------------

if __name__ == "__main__":
    # Small shapes consistent with the module: d_model=32, nhead=4, num_layers=2,
    # dim_feedforward=64, max_len=64, batch=2, seq=8.
    B, S, D, H, FF, L = 2, 8, 32, 4, 64, 2
    key = jax.random.PRNGKey(0)
    kx, kp = jax.random.split(key)

    x = jax.random.normal(kx, (B, S, D), jnp.float32)
    lengths = jnp.array([8, 6])
    padding_mask = jnp.arange(S)[None, :] >= lengths[:, None]   # bool (B,S), True = pad

    pe = make_pe(64, D)
    logical = init_params(kp, L, D, H, FF)
    kparams = pack_params(logical, H)

    out = temporal_transformer(x, padding_mask, kparams, pe, H)
    out = jax.block_until_ready(out)

    ref = reference(x, padding_mask, logical, pe, H)
    err = float(jnp.max(jnp.abs(out - ref)))
    # bf16 matmul operands (f32 accumulation) + approx reciprocal vs. the all-f32 reference
    # (same weight values) -> tolerance reflects activation-rounding noise only.
    assert err < 5e-2, f"max abs error {err}"

    print("KERNEL_OK")
</pallas_src>

<mosaic_0001>
module attributes {stable_mosaic.version = 11 : i64} {
  func.func @_fused_transformer_kernel(%arg0: i32, %arg1: i32, %arg2: memref<16x32xf32, #tpu.memory_space<vmem>>, %arg3: memref<16x32xf32, #tpu.memory_space<vmem>>, %arg4: memref<2x1x8xf32, #tpu.memory_space<vmem>>, %arg5: memref<1x32x96xbf16, #tpu.memory_space<vmem>>, %arg6: memref<1x32x32xbf16, #tpu.memory_space<vmem>>, %arg7: memref<1x32x64xbf16, #tpu.memory_space<vmem>>, %arg8: memref<1x64x32xbf16, #tpu.memory_space<vmem>>, %arg9: memref<1x8x96xf32, #tpu.memory_space<vmem>>, %arg10: memref<16x32xf32, #tpu.memory_space<vmem>>, %arg11: memref<16x32xf32, #tpu.memory_space<vmem>>) attributes {dimension_semantics = [#tpu.dimension_semantics<parallel>, #tpu.dimension_semantics<arbitrary>], iteration_bounds = array<i64: 1, 2>, scalar_prefetch = 0 : i64, scratch_operands = 1 : i64, tpu.core_type = #tpu.core_type<tc>, window_params = [{transform_indices = @transform_0, window_bounds = array<i64: 16, 32>}, {pipeline_mode = #tpu.pipeline_mode<synchronous>, transform_indices = @transform_1, window_bounds = array<i64: 16, 32>}, {transform_indices = @transform_2, window_bounds = array<i64: 2, 1, 8>}, {transform_indices = @transform_3, window_bounds = array<i64: 1, 32, 96>}, {transform_indices = @transform_4, window_bounds = array<i64: 1, 32, 32>}, {transform_indices = @transform_5, window_bounds = array<i64: 1, 32, 64>}, {transform_indices = @transform_6, window_bounds = array<i64: 1, 64, 32>}, {transform_indices = @transform_7, window_bounds = array<i64: 1, 8, 96>}, {transform_indices = @transform_8, window_bounds = array<i64: 16, 32>}]} {
    %c0_i32 = arith.constant 0 : i32
    %0 = arith.cmpi eq, %arg1, %c0_i32 : i32
    %1 = arith.extui %0 : i1 to i32
    %c0_i32_0 = arith.constant 0 : i32
    %2 = arith.cmpi ne, %1, %c0_i32_0 : i32
    scf.if %2 {
      %c0_56 = arith.constant 0 : index
      %c0_57 = arith.constant 0 : index
      %204 = vector.load %arg2[%c0_56, %c0_57] : memref<16x32xf32, #tpu.memory_space<vmem>>, vector<16x32xf32>
      %c0_58 = arith.constant 0 : index
      %c0_59 = arith.constant 0 : index
      %205 = vector.load %arg3[%c0_58, %c0_59] : memref<16x32xf32, #tpu.memory_space<vmem>>, vector<16x32xf32>
      %206 = arith.addf %204, %205 : vector<16x32xf32>
      %c0_60 = arith.constant 0 : index
      %c0_61 = arith.constant 0 : index
      %207 = vector.load %arg11[%c0_60, %c0_61] : memref<16x32xf32, #tpu.memory_space<vmem>>, vector<16x32xf32>
      tpu.vector_store %arg11[%c0_60, %c0_61], %206 {strides = array<i32>} : memref<16x32xf32, #tpu.memory_space<vmem>>, vector<16x32xf32>,
    } else {
    }
    %c0 = arith.constant 0 : index
    %c0_1 = arith.constant 0 : index
    %3 = vector.load %arg11[%c0, %c0_1] : memref<16x32xf32, #tpu.memory_space<vmem>>, vector<16x32xf32>
    %4 = arith.truncf %3 : vector<16x32xf32> to vector<16x32xbf16>
    %c0_2 = arith.constant 0 : index
    %c0_3 = arith.constant 0 : index
    %c0_4 = arith.constant 0 : index
    %5 = vector.load %arg9[%c0_2, %c0_3, %c0_4] : memref<1x8x96xf32, #tpu.memory_space<vmem>>, vector<1x8x96xf32>
    %6 = vector.shape_cast %5 : vector<1x8x96xf32> to vector<8x96xf32>
    %7 = vector.extract_strided_slice %6 {offsets = [0, 0], sizes = [1, 96], strides = [1, 1]} : vector<8x96xf32> to vector<1x96xf32>
    %8 = vector.extract_strided_slice %6 {offsets = [1, 0], sizes = [1, 32], strides = [1, 1]} : vector<8x96xf32> to vector<1x32xf32>
    %9 = vector.extract_strided_slice %6 {offsets = [2, 0], sizes = [1, 64], strides = [1, 1]} : vector<8x96xf32> to vector<1x64xf32>
    %10 = vector.extract_strided_slice %6 {offsets = [3, 0], sizes = [1, 32], strides = [1, 1]} : vector<8x96xf32> to vector<1x32xf32>
    %11 = vector.extract_strided_slice %6 {offsets = [4, 0], sizes = [1, 32], strides = [1, 1]} : vector<8x96xf32> to vector<1x32xf32>
    %12 = vector.extract_strided_slice %6 {offsets = [5, 0], sizes = [1, 32], strides = [1, 1]} : vector<8x96xf32> to vector<1x32xf32>
    %13 = vector.extract_strided_slice %6 {offsets = [6, 0], sizes = [1, 32], strides = [1, 1]} : vector<8x96xf32> to vector<1x32xf32>
    %14 = vector.extract_strided_slice %6 {offsets = [7, 0], sizes = [1, 32], strides = [1, 1]} : vector<8x96xf32> to vector<1x32xf32>
    %c0_5 = arith.constant 0 : index
    %c0_6 = arith.constant 0 : index
    %c0_7 = arith.constant 0 : index
    %15 = vector.load %arg5[%c0_5, %c0_6, %c0_7] : memref<1x32x96xbf16, #tpu.memory_space<vmem>>, vector<1x32x96xbf16>
    %16 = vector.shape_cast %15 : vector<1x32x96xbf16> to vector<32x96xbf16>
    %cst = arith.constant dense<0.000000e+00> : vector<16x96xf32>
    %17 = tpu.matmul %4, %16, %cst {dimension_numbers = #tpu.dot_dimension_numbers<[1], [0], [0], [1], [0, 0, 1, 1], [], []>} : vector<16x32xbf16>, vector<32x96xbf16>, vector<16x96xf32> -> vector<16x96xf32>
    %18 = vector.broadcast %7 : vector<1x96xf32> to vector<16x96xf32>
    %19 = arith.addf %17, %18 : vector<16x96xf32>
    %c0_8 = arith.constant 0 : index
    %c0_9 = arith.constant 0 : index
    %c0_10 = arith.constant 0 : index
    %20 = vector.load %arg4[%c0_8, %c0_9, %c0_10] : memref<2x1x8xf32, #tpu.memory_space<vmem>>, vector<2x1x8xf32>
    %c0_11 = arith.constant 0 : index
    %c0_12 = arith.constant 0 : index
    %c0_13 = arith.constant 0 : index
    %21 = vector.load %arg6[%c0_11, %c0_12, %c0_13] : memref<1x32x32xbf16, #tpu.memory_space<vmem>>, vector<1x32x32xbf16>
    %22 = vector.shape_cast %21 : vector<1x32x32xbf16> to vector<32x32xbf16>
    %23 = vector.extract_strided_slice %19 {offsets = [0, 0], sizes = [16, 8], strides = [1, 1]} : vector<16x96xf32> to vector<16x8xf32>
    %24 = vector.shape_cast %23 : vector<16x8xf32> to vector<2x8x8xf32>
    %25 = arith.truncf %24 : vector<2x8x8xf32> to vector<2x8x8xbf16>
    %26 = vector.extract_strided_slice %19 {offsets = [0, 32], sizes = [16, 8], strides = [1, 1]} : vector<16x96xf32> to vector<16x8xf32>
    %27 = vector.shape_cast %26 : vector<16x8xf32> to vector<2x8x8xf32>
    %28 = arith.truncf %27 : vector<2x8x8xf32> to vector<2x8x8xbf16>
    %29 = vector.extract_strided_slice %19 {offsets = [0, 64], sizes = [16, 8], strides = [1, 1]} : vector<16x96xf32> to vector<16x8xf32>
    %30 = vector.shape_cast %29 : vector<16x8xf32> to vector<2x8x8xf32>
    %31 = arith.truncf %30 : vector<2x8x8xf32> to vector<2x8x8xbf16>
    "tpu.trace_start"() <{level = 10 : i32, message = "bqd,bkd->bqk"}> : () -> ()
    %cst_14 = arith.constant dense<0.000000e+00> : vector<2x8x8xf32>
    %32 = tpu.matmul %25, %28, %cst_14 {dimension_numbers = #tpu.dot_dimension_numbers<[2], [2], [1], [1], [0, 0, 0, 1, 1, 1], [0], [0]>} : vector<2x8x8xbf16>, vector<2x8x8xbf16>, vector<2x8x8xf32> -> vector<2x8x8xf32>
    "tpu.trace_stop"() : () -> ()
    %33 = vector.broadcast %20 : vector<2x1x8xf32> to vector<2x8x8xf32>
    %34 = arith.addf %32, %33 : vector<2x8x8xf32>
    %cst_15 = arith.constant dense<0xFF800000> : vector<2x8xf32>
    %35 = vector.multi_reduction <maximumf>, %34, %cst_15 [2] : vector<2x8x8xf32> to vector<2x8xf32>
    %36 = vector.shape_cast %35 : vector<2x8xf32> to vector<2x8x1xf32>
    %37 = vector.broadcast %36 : vector<2x8x1xf32> to vector<2x8x8xf32>
    %38 = arith.subf %34, %37 : vector<2x8x8xf32>
    %39 = math.exp %38 : vector<2x8x8xf32>
    %cst_16 = arith.constant dense<0.000000e+00> : vector<2x8xf32>
    %40 = vector.multi_reduction <add>, %39, %cst_16 [2] : vector<2x8x8xf32> to vector<2x8xf32>
    %41 = vector.shape_cast %40 : vector<2x8xf32> to vector<2x8x1xf32>
    %42 = tpu.reciprocal %41 {approx = true} : vector<2x8x1xf32> -> vector<2x8x1xf32>
    %43 = vector.broadcast %42 : vector<2x8x1xf32> to vector<2x8x8xf32>
    %44 = arith.mulf %39, %43 : vector<2x8x8xf32>
    %45 = arith.truncf %44 : vector<2x8x8xf32> to vector<2x8x8xbf16>
    "tpu.trace_start"() <{level = 10 : i32, message = "bqk,bkd->bqd"}> : () -> ()
    %cst_17 = arith.constant dense<0.000000e+00> : vector<2x8x8xf32>
    %46 = tpu.matmul %45, %31, %cst_17 {dimension_numbers = #tpu.dot_dimension_numbers<[2], [1], [1], [2], [0, 0, 0, 1, 1, 2], [0], [0]>} : vector<2x8x8xbf16>, vector<2x8x8xbf16>, vector<2x8x8xf32> -> vector<2x8x8xf32>
    "tpu.trace_stop"() : () -> ()
    %47 = vector.shape_cast %46 : vector<2x8x8xf32> to vector<16x8xf32>
    %48 = arith.truncf %47 : vector<16x8xf32> to vector<16x8xbf16>
    %49 = vector.extract_strided_slice %22 {offsets = [0, 0], sizes = [8, 32], strides = [1, 1]} : vector<32x32xbf16> to vector<8x32xbf16>
    %cst_18 = arith.constant dense<0.000000e+00> : vector<16x32xf32>
    %50 = tpu.matmul %48, %49, %cst_18 {dimension_numbers = #tpu.dot_dimension_numbers<[1], [0], [0], [1], [0, 0, 1, 1], [], []>} : vector<16x8xbf16>, vector<8x32xbf16>, vector<16x32xf32> -> vector<16x32xf32>
    %51 = vector.extract_strided_slice %19 {offsets = [0, 8], sizes = [16, 8], strides = [1, 1]} : vector<16x96xf32> to vector<16x8xf32>
    %52 = vector.shape_cast %51 : vector<16x8xf32> to vector<2x8x8xf32>
    %53 = arith.truncf %52 : vector<2x8x8xf32> to vector<2x8x8xbf16>
    %54 = vector.extract_strided_slice %19 {offsets = [0, 40], sizes = [16, 8], strides = [1, 1]} : vector<16x96xf32> to vector<16x8xf32>
    %55 = vector.shape_cast %54 : vector<16x8xf32> to vector<2x8x8xf32>
    %56 = arith.truncf %55 : vector<2x8x8xf32> to vector<2x8x8xbf16>
    %57 = vector.extract_strided_slice %19 {offsets = [0, 72], sizes = [16, 8], strides = [1, 1]} : vector<16x96xf32> to vector<16x8xf32>
    %58 = vector.shape_cast %57 : vector<16x8xf32> to vector<2x8x8xf32>
    %59 = arith.truncf %58 : vector<2x8x8xf32> to vector<2x8x8xbf16>
    "tpu.trace_start"() <{level = 10 : i32, message = "bqd,bkd->bqk"}> : () -> ()
    %cst_19 = arith.constant dense<0.000000e+00> : vector<2x8x8xf32>
    %60 = tpu.matmul %53, %56, %cst_19 {dimension_numbers = #tpu.dot_dimension_numbers<[2], [2], [1], [1], [0, 0, 0, 1, 1, 1], [0], [0]>} : vector<2x8x8xbf16>, vector<2x8x8xbf16>, vector<2x8x8xf32> -> vector<2x8x8xf32>
    "tpu.trace_stop"() : () -> ()
    %61 = vector.broadcast %20 : vector<2x1x8xf32> to vector<2x8x8xf32>
    %62 = arith.addf %60, %61 : vector<2x8x8xf32>
    %cst_20 = arith.constant dense<0xFF800000> : vector<2x8xf32>
    %63 = vector.multi_reduction <maximumf>, %62, %cst_20 [2] : vector<2x8x8xf32> to vector<2x8xf32>
    %64 = vector.shape_cast %63 : vector<2x8xf32> to vector<2x8x1xf32>
    %65 = vector.broadcast %64 : vector<2x8x1xf32> to vector<2x8x8xf32>
    %66 = arith.subf %62, %65 : vector<2x8x8xf32>
    %67 = math.exp %66 : vector<2x8x8xf32>
    %cst_21 = arith.constant dense<0.000000e+00> : vector<2x8xf32>
    %68 = vector.multi_reduction <add>, %67, %cst_21 [2] : vector<2x8x8xf32> to vector<2x8xf32>
    %69 = vector.shape_cast %68 : vector<2x8xf32> to vector<2x8x1xf32>
    %70 = tpu.reciprocal %69 {approx = true} : vector<2x8x1xf32> -> vector<2x8x1xf32>
    %71 = vector.broadcast %70 : vector<2x8x1xf32> to vector<2x8x8xf32>
    %72 = arith.mulf %67, %71 : vector<2x8x8xf32>
    %73 = arith.truncf %72 : vector<2x8x8xf32> to vector<2x8x8xbf16>
    "tpu.trace_start"() <{level = 10 : i32, message = "bqk,bkd->bqd"}> : () -> ()
    %cst_22 = arith.constant dense<0.000000e+00> : vector<2x8x8xf32>
    %74 = tpu.matmul %73, %59, %cst_22 {dimension_numbers = #tpu.dot_dimension_numbers<[2], [1], [1], [2], [0, 0, 0, 1, 1, 2], [0], [0]>} : vector<2x8x8xbf16>, vector<2x8x8xbf16>, vector<2x8x8xf32> -> vector<2x8x8xf32>
    "tpu.trace_stop"() : () -> ()
    %75 = vector.shape_cast %74 : vector<2x8x8xf32> to vector<16x8xf32>
    %76 = arith.truncf %75 : vector<16x8xf32> to vector<16x8xbf16>
    %77 = vector.extract_strided_slice %22 {offsets = [8, 0], sizes = [8, 32], strides = [1, 1]} : vector<32x32xbf16> to vector<8x32xbf16>
    %cst_23 = arith.constant dense<0.000000e+00> : vector<16x32xf32>
    %78 = tpu.matmul %76, %77, %cst_23 {dimension_numbers = #tpu.dot_dimension_numbers<[1], [0], [0], [1], [0, 0, 1, 1], [], []>} : vector<16x8xbf16>, vector<8x32xbf16>, vector<16x32xf32> -> vector<16x32xf32>
    %79 = arith.addf %50, %78 : vector<16x32xf32>
    %80 = vector.extract_strided_slice %19 {offsets = [0, 16], sizes = [16, 8], strides = [1, 1]} : vector<16x96xf32> to vector<16x8xf32>
    %81 = vector.shape_cast %80 : vector<16x8xf32> to vector<2x8x8xf32>
    %82 = arith.truncf %81 : vector<2x8x8xf32> to vector<2x8x8xbf16>
    %83 = vector.extract_strided_slice %19 {offsets = [0, 48], sizes = [16, 8], strides = [1, 1]} : vector<16x96xf32> to vector<16x8xf32>
    %84 = vector.shape_cast %83 : vector<16x8xf32> to vector<2x8x8xf32>
    %85 = arith.truncf %84 : vector<2x8x8xf32> to vector<2x8x8xbf16>
    %86 = vector.extract_strided_slice %19 {offsets = [0, 80], sizes = [16, 8], strides = [1, 1]} : vector<16x96xf32> to vector<16x8xf32>
    %87 = vector.shape_cast %86 : vector<16x8xf32> to vector<2x8x8xf32>
    %88 = arith.truncf %87 : vector<2x8x8xf32> to vector<2x8x8xbf16>
    "tpu.trace_start"() <{level = 10 : i32, message = "bqd,bkd->bqk"}> : () -> ()
    %cst_24 = arith.constant dense<0.000000e+00> : vector<2x8x8xf32>
    %89 = tpu.matmul %82, %85, %cst_24 {dimension_numbers = #tpu.dot_dimension_numbers<[2], [2], [1], [1], [0, 0, 0, 1, 1, 1], [0], [0]>} : vector<2x8x8xbf16>, vector<2x8x8xbf16>, vector<2x8x8xf32> -> vector<2x8x8xf32>
    "tpu.trace_stop"() : () -> ()
    %90 = vector.broadcast %20 : vector<2x1x8xf32> to vector<2x8x8xf32>
    %91 = arith.addf %89, %90 : vector<2x8x8xf32>
    %cst_25 = arith.constant dense<0xFF800000> : vector<2x8xf32>
    %92 = vector.multi_reduction <maximumf>, %91, %cst_25 [2] : vector<2x8x8xf32> to vector<2x8xf32>
    %93 = vector.shape_cast %92 : vector<2x8xf32> to vector<2x8x1xf32>
    %94 = vector.broadcast %93 : vector<2x8x1xf32> to vector<2x8x8xf32>
    %95 = arith.subf %91, %94 : vector<2x8x8xf32>
    %96 = math.exp %95 : vector<2x8x8xf32>
    %cst_26 = arith.constant dense<0.000000e+00> : vector<2x8xf32>
    %97 = vector.multi_reduction <add>, %96, %cst_26 [2] : vector<2x8x8xf32> to vector<2x8xf32>
    %98 = vector.shape_cast %97 : vector<2x8xf32> to vector<2x8x1xf32>
    %99 = tpu.reciprocal %98 {approx = true} : vector<2x8x1xf32> -> vector<2x8x1xf32>
    %100 = vector.broadcast %99 : vector<2x8x1xf32> to vector<2x8x8xf32>
    %101 = arith.mulf %96, %100 : vector<2x8x8xf32>
    %102 = arith.truncf %101 : vector<2x8x8xf32> to vector<2x8x8xbf16>
    "tpu.trace_start"() <{level = 10 : i32, message = "bqk,bkd->bqd"}> : () -> ()
    %cst_27 = arith.constant dense<0.000000e+00> : vector<2x8x8xf32>
    %103 = tpu.matmul %102, %88, %cst_27 {dimension_numbers = #tpu.dot_dimension_numbers<[2], [1], [1], [2], [0, 0, 0, 1, 1, 2], [0], [0]>} : vector<2x8x8xbf16>, vector<2x8x8xbf16>, vector<2x8x8xf32> -> vector<2x8x8xf32>
    "tpu.trace_stop"() : () -> ()
    %104 = vector.shape_cast %103 : vector<2x8x8xf32> to vector<16x8xf32>
    %105 = arith.truncf %104 : vector<16x8xf32> to vector<16x8xbf16>
    %106 = vector.extract_strided_slice %22 {offsets = [16, 0], sizes = [8, 32], strides = [1, 1]} : vector<32x32xbf16> to vector<8x32xbf16>
    %cst_28 = arith.constant dense<0.000000e+00> : vector<16x32xf32>
    %107 = tpu.matmul %105, %106, %cst_28 {dimension_numbers = #tpu.dot_dimension_numbers<[1], [0], [0], [1], [0, 0, 1, 1], [], []>} : vector<16x8xbf16>, vector<8x32xbf16>, vector<16x32xf32> -> vector<16x32xf32>
    %108 = arith.addf %79, %107 : vector<16x32xf32>
    %109 = vector.extract_strided_slice %19 {offsets = [0, 24], sizes = [16, 8], strides = [1, 1]} : vector<16x96xf32> to vector<16x8xf32>
    %110 = vector.shape_cast %109 : vector<16x8xf32> to vector<2x8x8xf32>
    %111 = arith.truncf %110 : vector<2x8x8xf32> to vector<2x8x8xbf16>
    %112 = vector.extract_strided_slice %19 {offsets = [0, 56], sizes = [16, 8], strides = [1, 1]} : vector<16x96xf32> to vector<16x8xf32>
    %113 = vector.shape_cast %112 : vector<16x8xf32> to vector<2x8x8xf32>
    %114 = arith.truncf %113 : vector<2x8x8xf32> to vector<2x8x8xbf16>
    %115 = vector.extract_strided_slice %19 {offsets = [0, 88], sizes = [16, 8], strides = [1, 1]} : vector<16x96xf32> to vector<16x8xf32>
    %116 = vector.shape_cast %115 : vector<16x8xf32> to vector<2x8x8xf32>
    %117 = arith.truncf %116 : vector<2x8x8xf32> to vector<2x8x8xbf16>
    "tpu.trace_start"() <{level = 10 : i32, message = "bqd,bkd->bqk"}> : () -> ()
    %cst_29 = arith.constant dense<0.000000e+00> : vector<2x8x8xf32>
    %118 = tpu.matmul %111, %114, %cst_29 {dimension_numbers = #tpu.dot_dimension_numbers<[2], [2], [1], [1], [0, 0, 0, 1, 1, 1], [0], [0]>} : vector<2x8x8xbf16>, vector<2x8x8xbf16>, vector<2x8x8xf32> -> vector<2x8x8xf32>
    "tpu.trace_stop"() : () -> ()
    %119 = vector.broadcast %20 : vector<2x1x8xf32> to vector<2x8x8xf32>
    %120 = arith.addf %118, %119 : vector<2x8x8xf32>
    %cst_30 = arith.constant dense<0xFF800000> : vector<2x8xf32>
    %121 = vector.multi_reduction <maximumf>, %120, %cst_30 [2] : vector<2x8x8xf32> to vector<2x8xf32>
    %122 = vector.shape_cast %121 : vector<2x8xf32> to vector<2x8x1xf32>
    %123 = vector.broadcast %122 : vector<2x8x1xf32> to vector<2x8x8xf32>
    %124 = arith.subf %120, %123 : vector<2x8x8xf32>
    %125 = math.exp %124 : vector<2x8x8xf32>
    %cst_31 = arith.constant dense<0.000000e+00> : vector<2x8xf32>
    %126 = vector.multi_reduction <add>, %125, %cst_31 [2] : vector<2x8x8xf32> to vector<2x8xf32>
    %127 = vector.shape_cast %126 : vector<2x8xf32> to vector<2x8x1xf32>
    %128 = tpu.reciprocal %127 {approx = true} : vector<2x8x1xf32> -> vector<2x8x1xf32>
    %129 = vector.broadcast %128 : vector<2x8x1xf32> to vector<2x8x8xf32>
    %130 = arith.mulf %125, %129 : vector<2x8x8xf32>
    %131 = arith.truncf %130 : vector<2x8x8xf32> to vector<2x8x8xbf16>
    "tpu.trace_start"() <{level = 10 : i32, message = "bqk,bkd->bqd"}> : () -> ()
    %cst_32 = arith.constant dense<0.000000e+00> : vector<2x8x8xf32>
    %132 = tpu.matmul %131, %117, %cst_32 {dimension_numbers = #tpu.dot_dimension_numbers<[2], [1], [1], [2], [0, 0, 0, 1, 1, 2], [0], [0]>} : vector<2x8x8xbf16>, vector<2x8x8xbf16>, vector<2x8x8xf32> -> vector<2x8x8xf32>
    "tpu.trace_stop"() : () -> ()
    %133 = vector.shape_cast %132 : vector<2x8x8xf32> to vector<16x8xf32>
    %134 = arith.truncf %133 : vector<16x8xf32> to vector<16x8xbf16>
    %135 = vector.extract_strided_slice %22 {offsets = [24, 0], sizes = [8, 32], strides = [1, 1]} : vector<32x32xbf16> to vector<8x32xbf16>
    %cst_33 = arith.constant dense<0.000000e+00> : vector<16x32xf32>
    %136 = tpu.matmul %134, %135, %cst_33 {dimension_numbers = #tpu.dot_dimension_numbers<[1], [0], [0], [1], [0, 0, 1, 1], [], []>} : vector<16x8xbf16>, vector<8x32xbf16>, vector<16x32xf32> -> vector<16x32xf32>
    %137 = arith.addf %108, %136 : vector<16x32xf32>
    %138 = vector.broadcast %8 : vector<1x32xf32> to vector<16x32xf32>
    %139 = arith.addf %137, %138 : vector<16x32xf32>
    %140 = arith.addf %3, %139 : vector<16x32xf32>
    %cst_34 = arith.constant dense<0.000000e+00> : vector<16xf32>
    %141 = vector.multi_reduction <add>, %140, %cst_34 [1] : vector<16x32xf32> to vector<16xf32>
    %142 = vector.shape_cast %141 : vector<16xf32> to vector<16x1xf32>
    %cst_35 = arith.constant 3.200000e+01 : f32
    %143 = vector.broadcast %cst_35 : f32 to vector<16x1xf32>
    %144 = arith.divf %142, %143 : vector<16x1xf32>
    %145 = vector.broadcast %144 : vector<16x1xf32> to vector<16x32xf32>
    %146 = arith.subf %140, %145 : vector<16x32xf32>
    %147 = arith.mulf %146, %146 : vector<16x32xf32>
    %cst_36 = arith.constant dense<0.000000e+00> : vector<16xf32>
    %148 = vector.multi_reduction <add>, %147, %cst_36 [1] : vector<16x32xf32> to vector<16xf32>
    %149 = vector.shape_cast %148 : vector<16xf32> to vector<16x1xf32>
    %cst_37 = arith.constant 3.200000e+01 : f32
    %150 = vector.broadcast %cst_37 : f32 to vector<16x1xf32>
    %151 = arith.divf %149, %150 : vector<16x1xf32>
    %152 = vector.broadcast %144 : vector<16x1xf32> to vector<16x32xf32>
    %153 = arith.subf %140, %152 : vector<16x32xf32>
    %cst_38 = arith.constant 9.99999974E-6 : f32
    %154 = vector.broadcast %cst_38 : f32 to vector<16x1xf32>
    %155 = arith.addf %151, %154 : vector<16x1xf32>
    %156 = math.rsqrt %155 : vector<16x1xf32>
    %157 = vector.broadcast %156 : vector<16x1xf32> to vector<16x32xf32>
    %158 = arith.mulf %153, %157 : vector<16x32xf32>
    %159 = vector.broadcast %11 : vector<1x32xf32> to vector<16x32xf32>
    %160 = arith.mulf %158, %159 : vector<16x32xf32>
    %161 = vector.broadcast %12 : vector<1x32xf32> to vector<16x32xf32>
    %162 = arith.addf %160, %161 : vector<16x32xf32>
    %163 = arith.truncf %162 : vector<16x32xf32> to vector<16x32xbf16>
    %c0_39 = arith.constant 0 : index
    %c0_40 = arith.constant 0 : index
    %c0_41 = arith.constant 0 : index
    %164 = vector.load %arg7[%c0_39, %c0_40, %c0_41] : memref<1x32x64xbf16, #tpu.memory_space<vmem>>, vector<1x32x64xbf16>
    %165 = vector.shape_cast %164 : vector<1x32x64xbf16> to vector<32x64xbf16>
    %cst_42 = arith.constant dense<0.000000e+00> : vector<16x64xf32>
    %166 = tpu.matmul %163, %165, %cst_42 {dimension_numbers = #tpu.dot_dimension_numbers<[1], [0], [0], [1], [0, 0, 1, 1], [], []>} : vector<16x32xbf16>, vector<32x64xbf16>, vector<16x64xf32> -> vector<16x64xf32>
    %167 = vector.broadcast %9 : vector<1x64xf32> to vector<16x64xf32>
    %168 = arith.addf %166, %167 : vector<16x64xf32>
    %cst_43 = arith.constant 0.000000e+00 : f32
    %169 = vector.broadcast %cst_43 : f32 to vector<16x64xf32>
    %170 = arith.maximumf %168, %169 : vector<16x64xf32>
    %171 = arith.truncf %170 : vector<16x64xf32> to vector<16x64xbf16>
    %c0_44 = arith.constant 0 : index
    %c0_45 = arith.constant 0 : index
    %c0_46 = arith.constant 0 : index
    %172 = vector.load %arg8[%c0_44, %c0_45, %c0_46] : memref<1x64x32xbf16, #tpu.memory_space<vmem>>, vector<1x64x32xbf16>
    %173 = vector.shape_cast %172 : vector<1x64x32xbf16> to vector<64x32xbf16>
    %cst_47 = arith.constant dense<0.000000e+00> : vector<16x32xf32>
    %174 = tpu.matmul %171, %173, %cst_47 {dimension_numbers = #tpu.dot_dimension_numbers<[1], [0], [0], [1], [0, 0, 1, 1], [], []>} : vector<16x64xbf16>, vector<64x32xbf16>, vector<16x32xf32> -> vector<16x32xf32>
    %175 = vector.broadcast %10 : vector<1x32xf32> to vector<16x32xf32>
    %176 = arith.addf %174, %175 : vector<16x32xf32>
    %177 = arith.addf %162, %176 : vector<16x32xf32>
    %cst_48 = arith.constant dense<0.000000e+00> : vector<16xf32>
    %178 = vector.multi_reduction <add>, %177, %cst_48 [1] : vector<16x32xf32> to vector<16xf32>
    %179 = vector.shape_cast %178 : vector<16xf32> to vector<16x1xf32>
    %cst_49 = arith.constant 3.200000e+01 : f32
    %180 = vector.broadcast %cst_49 : f32 to vector<16x1xf32>
    %181 = arith.divf %179, %180 : vector<16x1xf32>
    %182 = vector.broadcast %181 : vector<16x1xf32> to vector<16x32xf32>
    %183 = arith.subf %177, %182 : vector<16x32xf32>
    %184 = arith.mulf %183, %183 : vector<16x32xf32>
    %cst_50 = arith.constant dense<0.000000e+00> : vector<16xf32>
    %185 = vector.multi_reduction <add>, %184, %cst_50 [1] : vector<16x32xf32> to vector<16xf32>
    %186 = vector.shape_cast %185 : vector<16xf32> to vector<16x1xf32>
    %cst_51 = arith.constant 3.200000e+01 : f32
    %187 = vector.broadcast %cst_51 : f32 to vector<16x1xf32>
    %188 = arith.divf %186, %187 : vector<16x1xf32>
    %189 = vector.broadcast %181 : vector<16x1xf32> to vector<16x32xf32>
    %190 = arith.subf %177, %189 : vector<16x32xf32>
    %cst_52 = arith.constant 9.99999974E-6 : f32
    %191 = vector.broadcast %cst_52 : f32 to vector<16x1xf32>
    %192 = arith.addf %188, %191 : vector<16x1xf32>
    %193 = math.rsqrt %192 : vector<16x1xf32>
    %194 = vector.broadcast %193 : vector<16x1xf32> to vector<16x32xf32>
    %195 = arith.mulf %190, %194 : vector<16x32xf32>
    %196 = vector.broadcast %13 : vector<1x32xf32> to vector<16x32xf32>
    %197 = arith.mulf %195, %196 : vector<16x32xf32>
    %198 = vector.broadcast %14 : vector<1x32xf32> to vector<16x32xf32>
    %199 = arith.addf %197, %198 : vector<16x32xf32>
    %c0_53 = arith.constant 0 : index
    %c0_54 = arith.constant 0 : index
    %200 = vector.load %arg11[%c0_53, %c0_54] : memref<16x32xf32, #tpu.memory_space<vmem>>, vector<16x32xf32>
    tpu.vector_store %arg11[%c0_53, %c0_54], %199 {strides = array<i32>} : memref<16x32xf32, #tpu.memory_space<vmem>>, vector<16x32xf32>,
    %c1_i32 = arith.constant 1 : i32
    %201 = arith.cmpi eq, %arg1, %c1_i32 : i32
    %202 = arith.extui %201 : i1 to i32
    %c0_i32_55 = arith.constant 0 : i32
    %203 = arith.cmpi ne, %202, %c0_i32_55 : i32
    scf.if %203 {
      %c0_56 = arith.constant 0 : index
      %c0_57 = arith.constant 0 : index
      %204 = vector.load %arg10[%c0_56, %c0_57] : memref<16x32xf32, #tpu.memory_space<vmem>>, vector<16x32xf32>
      tpu.vector_store %arg10[%c0_56, %c0_57], %199 {strides = array<i32>} : memref<16x32xf32, #tpu.memory_space<vmem>>, vector<16x32xf32>,
    } else {
    }
    return
  }
  func.func @transform_0(%arg0: i32, %arg1: i32) -> (i32, i32) {
    %c0_i32 = arith.constant 0 : i32
    %c0_i32_0 = arith.constant 0 : i32
    return %arg0, %c0_i32 : i32, i32
  }
  func.func @transform_1(%arg0: i32, %arg1: i32) -> (i32, i32) {
    %c0_i32 = arith.constant 0 : i32
    %c0_i32_0 = arith.constant 0 : i32
    %c0_i32_1 = arith.constant 0 : i32
    return %c0_i32, %c0_i32_0 : i32, i32
  }
  func.func @transform_2(%arg0: i32, %arg1: i32) -> (i32, i32, i32) {
    %c0_i32 = arith.constant 0 : i32
    %c0_i32_0 = arith.constant 0 : i32
    %c0_i32_1 = arith.constant 0 : i32
    return %arg0, %c0_i32, %c0_i32_0 : i32, i32, i32
  }
  func.func @transform_3(%arg0: i32, %arg1: i32) -> (i32, i32, i32) {
    %c0_i32 = arith.constant 0 : i32
    %c0_i32_0 = arith.constant 0 : i32
    %c0_i32_1 = arith.constant 0 : i32
    return %arg1, %c0_i32, %c0_i32_0 : i32, i32, i32
  }
  func.func @transform_4(%arg0: i32, %arg1: i32) -> (i32, i32, i32) {
    %c0_i32 = arith.constant 0 : i32
    %c0_i32_0 = arith.constant 0 : i32
    %c0_i32_1 = arith.constant 0 : i32
    return %arg1, %c0_i32, %c0_i32_0 : i32, i32, i32
  }
  func.func @transform_5(%arg0: i32, %arg1: i32) -> (i32, i32, i32) {
    %c0_i32 = arith.constant 0 : i32
    %c0_i32_0 = arith.constant 0 : i32
    %c0_i32_1 = arith.constant 0 : i32
    return %arg1, %c0_i32, %c0_i32_0 : i32, i32, i32
  }
  func.func @transform_6(%arg0: i32, %arg1: i32) -> (i32, i32, i32) {
    %c0_i32 = arith.constant 0 : i32
    %c0_i32_0 = arith.constant 0 : i32
    %c0_i32_1 = arith.constant 0 : i32
    return %arg1, %c0_i32, %c0_i32_0 : i32, i32, i32
  }
  func.func @transform_7(%arg0: i32, %arg1: i32) -> (i32, i32, i32) {
    %c0_i32 = arith.constant 0 : i32
    %c0_i32_0 = arith.constant 0 : i32
    %c0_i32_1 = arith.constant 0 : i32
    return %arg1, %c0_i32, %c0_i32_0 : i32, i32, i32
  }
  func.func @transform_8(%arg0: i32, %arg1: i32) -> (i32, i32) {
    %c0_i32 = arith.constant 0 : i32
    %c0_i32_0 = arith.constant 0 : i32
    return %arg0, %c0_i32 : i32, i32
  }
}

</mosaic_0001>

<bundles_post_ra>
// kernel: tpu_custom_call.1
= control target key start
LH: loop header
LB: loop body
LE: loop exit
PB: predicated region body
PF: predicated region fallthrough
CT: control target
= control target key end

     0   :  { %s2300_s0 = inlined_call_operand.hbm [shape: f32[16,32], index: 0, kind: input, shape index: {}]   ;;  %s2301_s1 = inlined_call_operand.hbm [shape: f32[16,32], index: 1, kind: input, shape index: {}]   ;;  %s2302_s2 = inlined_call_operand.hbm [shape: f32[2,1,8], index: 2, kind: input, shape index: {}]   ;;  %s2303_s3 = inlined_call_operand.vmem [shape: bf16[2,32,96], index: 3, kind: input, shape index: {}]   ;;  %s2304_s4 = inlined_call_operand.vmem [shape: bf16[2,32,32], index: 4, kind: input, shape index: {}]   ;;  %s2305_s5 = inlined_call_operand.vmem [shape: bf16[2,32,64], index: 5, kind: input, shape index: {}]   ;;  %s2306_s6 = inlined_call_operand.vmem [shape: bf16[2,64,32], index: 6, kind: input, shape index: {}]   ;;  %s2307_s7 = inlined_call_operand.hbm [shape: f32[2,8,96], index: 7, kind: input, shape index: {}]   ;;  %s2308_s8 = inlined_call_operand.hbm [shape: f32[16,32], index: 8, kind: output, shape index: {}]  }
   0x1   :  { %2310 = sst [smem:[#allocation16_spill]] %s2300_s0 }
   0x2   :  { %13 = vsyncpa [#allocation4], 0 }
   0x3   :  { %14 = vsyncpa [#allocation7], 0 }
   0x4   :  { %15 = vsyncpa [#allocation10], 0 }
   0x5   :  { %17 = vsyncpa [#allocation10 + $0x1], 0 }
   0x6   :  { %18 = vsyncpa [#allocation5], 0  ;;  %s1980_s27 = smov 0   ;;  %s1982_s28 = smov 0  }
   0x7   :  { %s1984_s29 = smov 0   ;;  %s1986_s30 = smov 0  }
   0x8   :  { %s1988_s9 = smov 0   ;;  %s1990_s10 = smov 0  }
   0x9 LB: > { %s2309_s11 = sadd.s32 4294967295, %s1911_s10   ;;  %p1453_p0 = scmp.ge.s32.totalorder %s1911_s10, 1  ;;  %s1911_s10 = sphi %s1990_s10, %s24_s10   ;;  %s1907_s9 = sphi %s1988_s9, %s2323_s9   ;;  %s1903_s30 = sphi %s1986_s30, %s2322_s30   ;;  %s1899_s29 = sphi %s1984_s29, %s2321_s29   ;;  %s1895_s28 = sphi %s1982_s28, %s2320_s28   ;;  %s1891_s27 = sphi %s1980_s27, %s2319_s27  }
   0xa   : > { %p2014_p1 = scmp.eq.s32.totalorder %s2309_s11, 0  ;;  %p270_p2 = scmp.lt.s32.totalorder %s1911_s10, 3 }
   0xb   : > { %s298_s15 = sshll.u32 %s2301_s1, 4  ;;  %s1913_s17 = smov [#allocation6]   ;;  %s299_s15 = int_to_ptr.hbm [resolvable:$true] %s298_s15 }
   0xc   : > { %p2022_p3 = pnand %p1453_p0, %p270_p2  ;;  %s300_s18 = sshll.u32 %s1913_s17, 4  ;;  %s301_s18 = int_to_ptr.vmem [resolvable:$true] %s300_s18 }
   0xd   : > { %s2314_s0 = sld [smem:[#allocation16_spill]]  ;;  %s1914_s23 = smov 128  }
   0xe   : > { %p1564_p4 = pneg %p2022_p3  ;;  %s1915_s24 = smov 8  }
   0xf   : > { %s1916_s25 = smov [#allocation3]   ;;  %s314_s17 = sshll.u32 %s2302_s2, 4  ;;  %s315_s17 = int_to_ptr.hbm [resolvable:$true] %s314_s17 }
  0x10   : > { %p2030_p5 = pnand %p1564_p4, %p2014_p1  ;;  %s286_s26 = sshll.u32 %s1916_s25, 4  ;;  %s287_s26 = int_to_ptr.vmem [resolvable:$true] %s286_s26 }
  0x11   : > { %s1917_s20 = smov [#allocation8]   ;;  %s33_s25 = sadd.s32 1, %s1907_s9 }
  0x12   : > { %1570 = dma.hbm_to_vmem [thread:$0]  (!%p2030_p5), %s299_s15, 256, %s301_s18, [#allocation7], %s1914_s23, %s1914_s23, %s1915_s24  }
  0x13   : > { %s284_s22 = sshll.u32 %s2314_s0, 4  ;;  %s316_s21 = sshll.u32 %s1917_s20, 4  ;;  %s285_s22 = int_to_ptr.hbm [resolvable:$true] %s284_s22  ;;  %s317_s21 = int_to_ptr.vmem [resolvable:$true] %s316_s21 }
  0x14   : > { %1567 = dma.hbm_to_vmem [thread:$0]  (!%p2030_p5), %s285_s22, 256, %s287_s26, [#allocation4], %s1914_s23, %s1914_s23, %s1915_s24  }
  0x15   : > { %s1918_s15 = smov 16   ;;  %s1919_s18 = smov 1  }
  0x16   : > { %1573 = dma.hbm_to_vmem [thread:$0]  (!%p2030_p5), %s315_s17, 32, %s317_s21, [#allocation7], %s1918_s15, %s1918_s15, %s1919_s18  }
  0x17   : > { %p34_p6 = scmp.ge.s32.totalorder %s33_s25, 2  ;;  %p227_p7 = scmp.ne.s32.totalorder %s1899_s29, %s1895_s28 }
  0x18   : > { %p228_p8 = scmp.eq.s32.totalorder %s1911_s10, 0  ;;  %s220_s22 = sadd.s32 1, %s1899_s29 }
  0x19   : > { %s2325_s25 = smov (%p34_p6, %s33_s25), 0  ;;  %p233_p9 = scmp.ne.s32.totalorder %s1895_s28, %s1891_s27 }
  0x1a   : > { %s217_s23 = ssub.s32 %s1907_s9, %s2325_s25  ;;  %p2057_p10 = por %p228_p8, %p227_p7 }
  0x1b   : > { %p218_p11 = scmp.eq.s32.totalorder %s217_s23, 0  ;;  %p2063_p12 = por %p2014_p1, %p233_p9 }
  0x1c   : > { %s362_s26 = sand.u32 1, %s1899_s29   ;;  %s1459_s13 = sshll.u32 %s1907_s9, 3 }
  0x1d   : > { %s2070_s14 = scalar_select %p218_p11, %s1899_s29, %s220_s22  }
  0x1e   : > { %p1581_p13 = scmp.lt.s32.totalorder %s1911_s10, 2  ;;  %s1458_s17 = sshll.u32 %s362_s26, 3 }
  0x1f   : > { %s370_s21 = scalar_lea.hbm %s2307_s7, %s1459_s13  ;;  %s366_s18 = scalar_lea.vmem [#allocation9], %s1458_s17 }
  0x20   : > { %s372_s15 = sshll.u32 %s370_s21, 4  ;;  %s374_s11 = sshll.u32 %s366_s18, 4  ;;  %s373_s15 = int_to_ptr.hbm [resolvable:$true] %s372_s15  ;;  %s375_s11 = int_to_ptr.vmem [resolvable:$true] %s374_s11 }
  0x21   : > { %p1575_p0 = pnand %p1581_p13, %p2057_p10  ;;  %s363_s23 = scalar_lea.sflag [#allocation10], %s362_s26 }
  0x22   : > { %383 = sbr.rel (%p2022_p3) target bundleno = 2621 (0xa3d), region = 52 }
  0x23   : > { %1577 = dma.hbm_to_vmem [thread:$0]  (!%p1575_p0), %s373_s15, 128, %s375_s11, %s363_s23  }
  0x27   : > { %1874 = dma.done.wait (%p2014_p1), [#allocation4], 256  }
  0x28   : > { %1876 = vsyncadd (%p2014_p1), [#allocation4], 4294967040 }
  0x29   : > { %1878 = dma.done.wait (%p2014_p1), [#allocation7], 288  }
  0x2a   : > { %1880 = vsyncadd (%p2014_p1), [#allocation7], 4294967008  ;;  %s400_s22 = sand.u32 1, %s1895_s28  }
  0x2b   : > { %s2089_s24 = sshll.u32 %s400_s22, 3  ;;  %s401_s11 = scalar_lea.sflag [#allocation10], %s400_s22 }
  0x2c   : > { %1882 = dma.done.wait (%p2063_p12), %s401_s11, 128  }
  0x2d   : > { %1884 = vsyncadd (%p2063_p12), %s401_s11, 4294967168  ;;  %p455_p2 = scmp.lt.s32.totalorder %s1903_s30, 1  ;;  %p1473_p1 = scmp.ne.s32.totalorder %s1903_s30, 0 }
  0x2f   : > { %s456_s26 = scalar_select %p455_p2, %s1903_s30, 1 }
  0x30   : > { %480 = sbr.rel (%p1473_p1) target bundleno = 58 (0x3a), region = 72 }
  0x31   : > { %s1534_s13 = sshll.u32 %s456_s26, 4  ;;  %s1537_s12 = sshll.u32 %s456_s26, 5 }
  0x32   : > { %s459_s27 = scalar_lea.vmem %s2303_s3, %s1534_s13  ;;  %s2104_s18 = scalar_lea.vmem %s2304_s4, %s1534_s13 }
  0x33   : > { %s2109_s19 = scalar_lea.vmem %s2305_s5, %s1534_s13  ;;  %s2114_s0 = scalar_lea.vmem %s2306_s6, %s1537_s12 }
  0x35   : > { %v481_v0 = vld [vmem:[#allocation3] sm:$0xff]  ;;  %v483_v1 = vld [vmem:[#allocation6] sm:$0xff]  ;;  %vm487_vm0 = vcmask 261120   ;;  %v482_v2 = vld [vmem:[#allocation3 + $0x8] sm:$0xff] }
  0x36   : > { %v485_v3 = vadd.f32 %v483_v1, %v481_v0  ;;  %v484_v4 = vld [vmem:[#allocation6 + $0x8] sm:$0xff] }
  0x37   : > { %v486_v5 = vadd.f32 %v484_v4, %v482_v2 }
  0x38   : > { %488 = vst.msk [vmem:[#allocation2] sm:$0xff] %vm487_vm0, %v485_v3 }
  0x39   : > { %489 = vst.msk [vmem:[#allocation2 + $0x8] sm:$0xff] %vm487_vm0, %v486_v5 }
  0x3a PF: > { %v1539_v6 = vld [vmem:[%s459_s27 + $0x8] sm:$0xff]  ;;  %v1538_v7 = vld [vmem:[%s459_s27] sm:$0xff]  ;;  %vm511_vm1 = vcmask 261120   ;;  %s2317_s16 = scalar_lea.vmem [#allocation9], %s2089_s24  ;;  %s1920_s26 = smov 96   ;;  %vm548_vm2 = vcmask 64512  }
  0x3b   : > { %521 = vmatpush.bf16.msra.mxu0 %v1539_v6  ;;  %v2126_v11 = vld [vmem:[%s2317_s16] sm:$0xff]  ;;  %s1921_s13 = smov 88   ;;  %s1922_s24 = smov 120   ;;  %vm621_vm3 = vcmask 1043456   ;;  %v2150_v35 = vld [vmem:[#allocation8] ss:$0 sm:$0xff] }
  0x3c   : > { %v498_v12 = vperm.slane %v2126_v11, 0  ;;  %s1923_s12 = smov 56   ;;  %v2156_v44 = vld [vmem:[#allocation8 + $0x1] ss:$0 sm:$0xff]  ;;  %s1924_s17 = smov 80   ;;  %vm1216_vm11 = vcmask 523264  }
  0x3d   : > { %s1925_s20 = smov 64   ;;  %s1926_s27 = smov 112  }
  0x3e   : > { %s1927_s21 = smov 48   ;;  %s1928_s15 = smov 72  }
  0x3f   : > { %v2117_v8 = vld [vmem:[#allocation2] sm:$0xff]  ;;  %522 = vmatpush.bf16.msra.mxu0 %v1538_v7  ;;  %s1929_s23 = smov 104   ;;  %s1930_s22 = smov 40  }
  0x40   : > { %v2119_v9 = vld [vmem:[#allocation2 + $0x8] sm:$0xff]  ;;  %p1529_p3 = scmp.ne.s32.totalorder %s1903_s30, 1 }
  0x41   : > { %v492_v10 = vpack.c.bf16 %v2119_v9, %v2117_v8 }
  0x43   : > { %1482 = vmatmul.msk.bf16.vlgmr.msra.gmra.mxu0 %vm511_vm1, %v492_v10 }
  0xc0   : > { %v524_v13 = vpop.f32.mrf.mxu0 }
  0xc1   : > { %v525_v14 = vadd.f32 %v524_v13, %v498_v12 }
  0xc3   : > { %v535_v15 = vpack.c.bf16 %v525_v14, %v525_v14 }
  0xc5   : > { %v544_v16 = vunpack.c.l.b16 %v535_v15 }
  0xc7   : > { %v2129_v17 = vpack.c.b16 %v544_v16, %v544_v16 }
  0xc8   : > { %v526_v18 = vpop.f32.mrf.mxu0 }
  0xc9   : > { %v527_v19 = vadd.f32 %v526_v18, %v498_v12  ;;  %546 = vrot.lane.b32.xlu1 %v2129_v17, %s1920_s26  ;;  %662 = vrot.lane.b32.xlu0 %v2129_v17, %s1921_s13 }
  0xcb   : > { %v536_v20 = vpack.c.bf16 %v527_v19, %v527_v19  ;;  %v532_v19 = vld [vmem:[%s2104_s18 + $0x4] sm:$0xf] }
  0xcd   : > { %v569_v21 = vunpack.c.l.b16 %v536_v20 }
  0xcf   : > { %v2133_v22 = vpack.c.b16 %v569_v21, %v569_v21 }
  0xd1   : > { %685 = vrot.lane.b32.xlu2 %v2133_v22, %s1921_s13  ;;  %571 = vrot.lane.b32.xlu1 %v2133_v22, %s1920_s26 }
  0xd2   : > { %660 = vrot.lane.b32.xlu0 %v2129_v17, %s1922_s24 }
  0xd9   : > { %683 = vrot.lane.b32.xlu2 %v2133_v22, %s1922_s24 }
  0xe1   : > { %730 = vrot.lane.b32.xlu2 %v2129_v17, %s1923_s12 }
 0x12b   : > { %v686_v23 = vpop.permute.xlu2 %685 }
 0x12c   : > { %v691_v29 = vsel %vm548_vm2, %v686_v23, 0 }
 0x133   : > { %v684_v24 = vpop.permute.xlu2 %683 }
 0x13b   : > { %v547_v25 = vpop.permute.xlu1 %546  ;;  %v663_v26 = vpop.permute.xlu0 %662 }
 0x13c   : > { %v553_v27 = vsel %vm548_vm2, %v547_v25, 0  ;;  %v668_v28 = vsel %vm548_vm2, %v663_v26, 0  ;;  %v731_v30 = vpop.permute.xlu2 %730 }
 0x13d   : > { %562 = vmatpush.bf16.xpose.msra.mxu1 %v553_v27  ;;  %677 = vmatpush.bf16.xpose.msrb.mxu0 %v668_v28  ;;  %v736_v34 = vsel %vm621_vm3, %v731_v30, 0 }
 0x143   : > { %v572_v31 = vpop.permute.xlu1 %571 }
 0x144   : > { %v661_v32 = vpop.permute.xlu0 %660  ;;  %1483 = vmatmul.msk.bf16.vlgmr.msra.gmra.mxu1 %vm548_vm2, %v535_v15  ;;  %v577_v33 = vsel %vm548_vm2, %v572_v31, 0 }
 0x145   : > { %700 = vmatpush.bf16.xpose.msrb.mxu1 %v691_v29  ;;  %1487 = vmatmul.msk.bf16.vlgmr.msrb.gmra.mxu0 %vm548_vm2, %v661_v32 }
 0x146   : > { %586 = vmatpush.bf16.xpose.msra.mxu2 %v577_v33 }
 0x14d   : > { %1484 = vmatmul.msk.bf16.vlgmr.msra.gmra.mxu2 %vm548_vm2, %v536_v20  ;;  %v777_v20 = vsel %vm621_vm3, %v532_v19, 0 }
 0x14e   : > { %745 = vmatpush.bf16.msrb.mxu2 %v736_v34  ;;  %786 = vmatpush.bf16.msra.mxu0 %v777_v20 }
 0x154   : > { %1488 = vmatmul.msk.bf16.vlgmr.msrb.gmra.mxu1 %vm548_vm2, %v684_v24 }
 0x1c1   : > { %v564_v36 = vpop.f32.mrf.mxu1 }
 0x1c2   : > { %v565_v37 = vadd.f32 %v2150_v35, %v564_v36  ;;  %v679_v38 = vpop.f32.mrf.mxu0 }
 0x1c3   : > { %v680_v39 = vadd.f32 %v2150_v35, %v679_v38 }
 0x1c4   : > { %v592_v40 = vsel %vm548_vm2, %v565_v37, -inf }
 0x1c5   : > { %593 = vmax.xlane.f32.xlu2 %v592_v40  ;;  %v706_v41 = vsel %vm548_vm2, %v680_v39, -inf }
 0x1c6   : > { %707 = vmax.xlane.f32.xlu0 %v706_v41 }
 0x1c9   : > { %v566_v42 = vpop.f32.mrf.mxu1 }
 0x1ca   : > { %v681_v43 = vpop.f32.mrf.mxu0 }
 0x1d0   : > { %v588_v45 = vpop.f32.mrf.mxu2 }
 0x1d1   : > { %v589_v46 = vadd.f32 %v2156_v44, %v588_v45  ;;  %v702_v47 = vpop.f32.mrf.mxu1 }
 0x1d2   : > { %v703_v49 = vadd.f32 %v2156_v44, %v702_v47 }
 0x1d3   : > { %v595_v48 = vsel %vm548_vm2, %v589_v46, -inf }
 0x1d4   : > { %596 = vmax.xlane.f32.xlu2 %v595_v48  ;;  %v709_v52 = vsel %vm548_vm2, %v703_v49, -inf }
 0x1d8   : > { %v590_v50 = vpop.f32.mrf.mxu2 }
 0x1d9   : > { %v704_v51 = vpop.f32.mrf.mxu1 }
 0x1da   : > { %815 = vrot.lane.b32.xlu0 %v2129_v17, %s1924_s17 }
 0x1dc   : > { %710 = vmax.xlane.f32.xlu2 %v709_v52 }
 0x1f4   : > { %616 = vrot.lane.b32.xlu2 %v2129_v17, %s1925_s20 }
 0x1fc   : > { %638 = vrot.lane.b32.xlu2 %v2133_v22, %s1925_s20 }
 0x238   : > { %v594_v53 = vpop.xlane.xlu2 %593 }
 0x239   : > { %v598_v54 = vsub.f32 %v565_v37, %v594_v53  ;;  %v708_v55 = vpop.xlane.xlu0 %707 }
 0x23a   : > { %v712_v56 = vsub.f32 %v680_v39, %v708_v55 }
 0x23b   : > { %v600_v57 = vmul.f32 1.442695, %v598_v54 }
 0x23c   : > { %v714_v58 = vmul.f32 1.442695, %v712_v56 }
 0x23d   : > { %1659 = vpow2.f32 %v600_v57 }
 0x23e   : > { %1661 = vpow2.f32 %v714_v58  ;;  %v531_v58 = vld [vmem:[%s2104_s18] sm:$0xf] }
 0x243   : > { %v1660_v59 = vpop.eup %1659 }
 0x244   : > { %v1662_v60 = vpop.eup %1661  ;;  %v604_v61 = vsel %vm548_vm2, %v1660_v59, 0.0 }
 0x245   : > { %605 = vadd.xlane.f32.xlu0 %v604_v61  ;;  %v718_v62 = vsel %vm548_vm2, %v1662_v60, 0.0 }
 0x246   : > { %719 = vadd.xlane.f32.xlu1 %v718_v62 }
 0x247   : > { %v597_v63 = vpop.xlane.xlu2 %596 }
 0x248   : > { %v599_v14 = vsub.f32 %v589_v46, %v597_v63 }
 0x24a   : > { %v602_v15 = vmul.f32 1.442695, %v599_v14 }
 0x24c   : > { %v816_v0 = vpop.permute.xlu0 %815 }
 0x24d   : > { %v821_v1 = vsel %vm548_vm2, %v816_v0, 0 }
 0x24e   : > { %830 = vmatpush.bf16.xpose.msra.mxu2 %v821_v1 }
 0x24f   : > { %v711_v2 = vpop.xlane.xlu2 %710 }
 0x250   : > { %v713_v3 = vsub.f32 %v703_v49, %v711_v2 }
 0x252   : > { %v716_v4 = vmul.f32 1.442695, %v713_v3 }
 0x254   : > { %1663 = vpow2.f32 %v716_v4 }
 0x255   : > { %1665 = vpow2.f32 %v602_v15 }
 0x257   : > { %v617_v5 = vpop.permute.xlu2 %616 }
 0x258   : > { %v623_v6 = vsel %vm621_vm3, %v617_v5, 0 }
 0x259   : > { %632 = vmatpush.bf16.msra.mxu3 %v623_v6  ;;  %751 = vrot.lane.b32.xlu0 %v2133_v22, %s1923_s12 }
 0x25a   : > { %v1664_v7 = vpop.eup %1663 }
 0x25b   : > { %v721_v10 = vsel %vm548_vm2, %v1664_v7, 0.0  ;;  %v1666_v16 = vpop.eup %1665 }
 0x25c   : > { %722 = vadd.xlane.f32.xlu2 %v721_v10  ;;  %v607_v18 = vsel %vm548_vm2, %v1666_v16, 0.0 }
 0x25f   : > { %v639_v12 = vpop.permute.xlu2 %638  ;;  %813 = vrot.lane.b32.xlu1 %v2129_v17, %s1926_s27 }
 0x260   : > { %v644_v13 = vsel %vm621_vm3, %v639_v12, 0 }
 0x261   : > { %653 = vmatpush.bf16.msrb.mxu3 %v644_v13  ;;  %836 = vrot.lane.b32.xlu0 %v2133_v22, %s1926_s27 }
 0x274   : > { %883 = vrot.lane.b32.xlu2 %v2129_v17, %s1927_s21 }
 0x27c   : > { %950 = vrot.lane.b32.xlu2 %v2129_v17, %s1928_s15 }
 0x284   : > { %973 = vrot.lane.b32.xlu2 %v2133_v22, %s1928_s15 }
 0x289   : > { %608 = vadd.xlane.f32.xlu1 %v607_v18 }
 0x2a2   : > { %838 = vrot.lane.b32.xlu1 %v2133_v22, %s1924_s17 }
 0x2b8   : > { %v606_v21 = vpop.xlane.xlu0 %605 }
 0x2b9   : > { %v720_v23 = vpop.xlane.xlu1 %719  ;;  %1667 = vrcp.f32 %v606_v21 }
 0x2ba   : > { %1669 = vrcp.f32 %v720_v23 }
 0x2bf   : > { %v1668_v24 = vpop.eup %1667 }
 0x2c0   : > { %v1670_v25 = vpop.eup %1669  ;;  %v612_v26 = vmul.f32 %v1668_v24, %v1660_v59  ;;  %v797_v59 = vsel %vm621_vm3, %v531_v58, 0 }
 0x2c1   : > { %v726_v27 = vmul.f32 %v1670_v25, %v1662_v60  ;;  %806 = vmatpush.bf16.msra.mxu1 %v797_v59 }
 0x2c2   : > { %v614_v28 = vpack.c.bf16 %v612_v26, %v612_v26 }
 0x2c3   : > { %v728_v29 = vpack.c.bf16 %v726_v27, %v726_v27 }
 0x2c4   : > { %1485 = vmatmul.msk.bf16.vlgmr.msra.gmra.mxu3 %vm548_vm2, %v614_v28 }
 0x2c5   : > { %1489 = vmatmul.msk.bf16.vlgmr.msrb.gmra.mxu2 %vm548_vm2, %v728_v29 }
 0x2cb   : > { %v752_v30 = vpop.permute.xlu0 %751 }
 0x2cc   : > { %v757_v31 = vsel %vm621_vm3, %v752_v30, 0 }
 0x2cd   : > { %766 = vmatpush.bf16.msra.mxu3 %v757_v31 }
 0x2cf   : > { %v723_v32 = vpop.xlane.xlu2 %722 }
 0x2d1   : > { %v814_v33 = vpop.permute.xlu1 %813 }
 0x2d3   : > { %v837_v49 = vpop.permute.xlu0 %836 }
 0x2d5   : > { %1493 = vmatmul.msk.bf16.vlgmr.msra.gmra.mxu2 %vm548_vm2, %v814_v33 }
 0x2d7   : > { %v884_v34 = vpop.permute.xlu2 %883 }
 0x2d8   : > { %v889_v36 = vsel %vm621_vm3, %v884_v34, 0 }
 0x2d9   : > { %898 = vmatpush.bf16.msrb.mxu0 %v889_v36 }
 0x2df   : > { %v951_v45 = vpop.permute.xlu2 %950 }
 0x2e0   : > { %v956_v48 = vsel %vm548_vm2, %v951_v45, 0 }
 0x2e7   : > { %v974_v63 = vpop.permute.xlu2 %973 }
 0x2e8   : > { %v979_v2 = vsel %vm548_vm2, %v974_v63, 0 }
 0x2fc   : > { %v609_v37 = vpop.xlane.xlu1 %608 }
 0x2fd   : > { %1671 = vrcp.f32 %v609_v37 }
 0x2fe   : > { %1673 = vrcp.f32 %v723_v32 }
 0x303   : > { %v1672_v38 = vpop.eup %1671 }
 0x304   : > { %v613_v39 = vmul.f32 %v1672_v38, %v1666_v16  ;;  %v1674_v41 = vpop.eup %1673  ;;  %v533_v38 = vld [vmem:[%s2104_s18 + $0x8] sm:$0xf] }
 0x305   : > { %v727_v42 = vmul.f32 %v1674_v41, %v1664_v7 }
 0x306   : > { %v615_v40 = vpack.c.bf16 %v613_v39, %v613_v39  ;;  %v930_v39 = vsel %vm621_vm3, %v533_v38, 0 }
 0x307   : > { %v729_v47 = vpack.c.bf16 %v727_v42, %v727_v42  ;;  %939 = vmatpush.bf16.msrb.mxu2 %v930_v39  ;;  %v1931_v39 = vmov 32.0  }
 0x308   : > { %1486 = vmatmul.msk.bf16.vlgmr.msrb.gmra.mxu3 %vm548_vm2, %v615_v40 }
 0x314   : > { %v839_v43 = vpop.permute.xlu1 %838 }
 0x315   : > { %v844_v46 = vsel %vm548_vm2, %v839_v43, 0 }
 0x316   : > { %853 = vmatpush.bf16.xpose.msrb.mxu3 %v844_v46 }
 0x318   : > { %1490 = vmatmul.msk.bf16.vlgmr.msra.gmra.mxu3 %vm548_vm2, %v729_v47 }
 0x31e   : > { %965 = vmatpush.bf16.xpose.msra.mxu3 %v956_v48 }
 0x328   : > { %1494 = vmatmul.msk.bf16.vlgmr.msrb.gmra.mxu3 %vm548_vm2, %v837_v49 }
 0x347   : > { %v634_v50 = vpop.f32.mrf.mxu3 }
 0x348   : > { %v747_v51 = vpop.f32.mrf.mxu2 }
 0x34f   : > { %v636_v52 = vpop.f32.mrf.mxu3 }
 0x350   : > { %v749_v53 = vpop.f32.mrf.mxu2 }
 0x358   : > { %v832_v54 = vpop.f32.mrf.mxu2 }
 0x359   : > { %v833_v55 = vadd.f32 %v2150_v35, %v832_v54 }
 0x35b   : > { %v859_v56 = vsel %vm548_vm2, %v833_v55, -inf }
 0x35c   : > { %860 = vmax.xlane.f32.xlu0 %v859_v56 }
 0x360   : > { %v834_v57 = vpop.f32.mrf.mxu2 }
 0x370   : > { %948 = vrot.lane.b32.xlu0 %v2129_v17, %s1929_s23 }
 0x38b   : > { %v655_v60 = vpop.f32.mrf.mxu3 }
 0x38c   : > { %v659_v61 = vpack.c.bf16 %v655_v60, %v634_v50 }
 0x38e   : > { %1492 = vmatmul.msk.bf16.vlgmr.msra.gmra.mxu1 %vm548_vm2, %v659_v61 }
 0x393   : > { %v657_v62 = vpop.f32.mrf.mxu3 }
 0x39b   : > { %v768_v0 = vpop.f32.mrf.mxu3 }
 0x39c   : > { %v772_v1 = vpack.c.bf16 %v768_v0, %v747_v51 }
 0x39e   : > { %1491 = vmatmul.msk.bf16.vlgmr.msra.gmra.mxu0 %vm548_vm2, %v772_v1 }
 0x39f   : > { %988 = vmatpush.bf16.xpose.msra.mxu0 %v979_v2 }
 0x3a3   : > { %v770_v3 = vpop.f32.mrf.mxu3 }
 0x3ab   : > { %v855_v4 = vpop.f32.mrf.mxu3 }
 0x3ac   : > { %v856_v5 = vadd.f32 %v2156_v44, %v855_v4 }
 0x3ae   : > { %v862_v6 = vsel %vm548_vm2, %v856_v5, -inf }
 0x3af   : > { %863 = vmax.xlane.f32.xlu2 %v862_v6 }
 0x3b3   : > { %v857_v7 = vpop.f32.mrf.mxu3 }
 0x3cf   : > { %v861_v10 = vpop.xlane.xlu0 %860 }
 0x3d0   : > { %v865_v12 = vsub.f32 %v833_v55, %v861_v10 }
 0x3d2   : > { %v867_v13 = vmul.f32 1.442695, %v865_v12 }
 0x3d4   : > { %1675 = vpow2.f32 %v867_v13 }
 0x3da   : > { %v1676_v14 = vpop.eup %1675 }
 0x3db   : > { %v871_v15 = vsel %vm548_vm2, %v1676_v14, 0.0 }
 0x3dc   : > { %872 = vadd.xlane.f32.xlu1 %v871_v15 }
 0x3e2   : > { %v949_v16 = vpop.permute.xlu0 %948 }
 0x3e3   : > { %1498 = vmatmul.msk.bf16.vlgmr.msra.gmra.mxu3 %vm548_vm2, %v949_v16 }
 0x3f5   : > { %971 = vrot.lane.b32.xlu1 %v2133_v22, %s1929_s23 }
 0x3fd   : > { %904 = vrot.lane.b32.xlu1 %v2133_v22, %s1927_s21 }
 0x40b   : > { %v808_v18 = vpop.f32.mrf.mxu1 }
 0x413   : > { %v810_v58 = vpop.f32.mrf.mxu1 }
 0x41b   : > { %v788_v19 = vpop.f32.mrf.mxu0 }
 0x41c   : > { %v2210_v20 = vadd.f32 %v808_v18, %v788_v19 }
 0x422   : > { %v864_v21 = vpop.xlane.xlu2 %863 }
 0x423   : > { %v866_v23 = vsub.f32 %v856_v5, %v864_v21  ;;  %v790_v46 = vpop.f32.mrf.mxu0 }
 0x425   : > { %v869_v24 = vmul.f32 1.442695, %v866_v23 }
 0x427   : > { %1677 = vpow2.f32 %v869_v24 }
 0x42d   : > { %v1678_v25 = vpop.eup %1677 }
 0x42e   : > { %v874_v26 = vsel %vm548_vm2, %v1678_v25, 0.0 }
 0x42f   : > { %875 = vadd.xlane.f32.xlu0 %v874_v26  ;;  %v1083_v26 = vperm.slane %v2126_v11, 1 }
 0x443   : > { %1039 = vrot.lane.b32.xlu0 %v2133_v22, %s1930_s22 }
 0x44f   : > { %v873_v27 = vpop.xlane.xlu1 %872 }
 0x450   : > { %1679 = vrcp.f32 %v873_v27 }
 0x456   : > { %v1680_v28 = vpop.eup %1679 }
 0x457   : > { %v879_v29 = vmul.f32 %v1680_v28, %v1676_v14 }
 0x459   : > { %v881_v30 = vpack.c.bf16 %v879_v29, %v879_v29 }
 0x45b   : > { %1495 = vmatmul.msk.bf16.vlgmr.msrb.gmra.mxu0 %vm548_vm2, %v881_v30  ;;  %v811_v30 = vadd.f32 %v810_v58, %v790_v46  ;;  %v1540_v58 = vld [vmem:[%s2109_s19] sm:$0xff] }
 0x466   : > { %v967_v31 = vpop.f32.mrf.mxu3 }
 0x467   : > { %v968_v32 = vadd.f32 %v2150_v35, %v967_v31  ;;  %v972_v33 = vpop.permute.xlu1 %971 }
 0x469   : > { %v994_v34 = vsel %vm548_vm2, %v968_v32, -inf }
 0x46a   : > { %995 = vmax.xlane.f32.xlu2 %v994_v34 }
 0x46b   : > { %1499 = vmatmul.msk.bf16.vlgmr.msra.gmra.mxu0 %vm548_vm2, %v972_v33 }
 0x46e   : > { %v969_v36 = vpop.f32.mrf.mxu3 }
 0x46f   : > { %v905_v37 = vpop.permute.xlu1 %904 }
 0x470   : > { %v910_v22 = vsel %vm621_vm3, %v905_v37, 0 }
 0x471   : > { %919 = vmatpush.bf16.msrb.mxu1 %v910_v22 }
 0x4a2   : > { %v876_v40 = vpop.xlane.xlu0 %875 }
 0x4a3   : > { %1681 = vrcp.f32 %v876_v40 }
 0x4a9   : > { %v1682_v41 = vpop.eup %1681 }
 0x4aa   : > { %v880_v42 = vmul.f32 %v1682_v41, %v1678_v25 }
 0x4ac   : > { %v882_v35 = vpack.c.bf16 %v880_v42, %v880_v42 }
 0x4ae   : > { %1496 = vmatmul.msk.bf16.vlgmr.msrb.gmra.mxu1 %vm548_vm2, %v882_v35 }
 0x4b5   : > { %v1040_v43 = vpop.permute.xlu0 %1039 }
 0x4b6   : > { %v1045_v45 = vsel %vm621_vm3, %v1040_v43, 0 }
 0x4b7   : > { %1054 = vmatpush.bf16.msra.mxu2 %v1045_v45 }
 0x4d8   : > { %v900_v47 = vpop.f32.mrf.mxu0 }
 0x4dd   : > { %v996_v48 = vpop.xlane.xlu2 %995 }
 0x4de   : > { %v1000_v49 = vsub.f32 %v968_v32, %v996_v48 }
 0x4e0   : > { %v1002_v50 = vmul.f32 1.442695, %v1000_v49  ;;  %v902_v51 = vpop.f32.mrf.mxu0 }
 0x4e2   : > { %1683 = vpow2.f32 %v1002_v50 }
 0x4e8   : > { %v1684_v52 = vpop.eup %1683  ;;  %v990_v53 = vpop.f32.mrf.mxu0 }
 0x4e9   : > { %v991_v54 = vadd.f32 %v2156_v44, %v990_v53  ;;  %v1006_v55 = vsel %vm548_vm2, %v1684_v52, 0.0 }
 0x4ea   : > { %1007 = vadd.xlane.f32.xlu2 %v1006_v55 }
 0x4eb   : > { %v997_v56 = vsel %vm548_vm2, %v991_v54, -inf }
 0x4ec   : > { %998 = vmax.xlane.f32.xlu1 %v997_v56 }
 0x4f0   : > { %v992_v57 = vpop.f32.mrf.mxu0 }
 0x52b   : > { %v921_v59 = vpop.f32.mrf.mxu1 }
 0x52c   : > { %v925_v60 = vpack.c.bf16 %v921_v59, %v900_v47 }
 0x52e   : > { %1497 = vmatmul.msk.bf16.vlgmr.msrb.gmra.mxu2 %vm548_vm2, %v925_v60 }
 0x533   : > { %v923_v61 = vpop.f32.mrf.mxu1 }
 0x55d   : > { %v1008_v4 = vpop.xlane.xlu2 %1007 }
 0x55f   : > { %v999_v62 = vpop.xlane.xlu1 %998 }
 0x560   : > { %v1001_v63 = vsub.f32 %v991_v54, %v999_v62  ;;  %v1541_v54 = vld [vmem:[%s2109_s19 + $0x8] sm:$0xff] }
 0x561   : > { %1172 = vmatpush.bf16.msrb.mxu0 %v1541_v54 }
 0x562   : > { %v1004_v0 = vmul.f32 1.442695, %v1001_v63 }
 0x564   : > { %1685 = vpow2.f32 %v1004_v0 }
 0x565   : > { %1687 = vrcp.f32 %v1008_v4  ;;  %1173 = vmatpush.bf16.msrb.mxu0 %v1540_v58 }
 0x56a   : > { %v1686_v1 = vpop.eup %1685 }
 0x56b   : > { %v1009_v44 = vsel %vm548_vm2, %v1686_v1, 0.0  ;;  %v1688_v6 = vpop.eup %1687 }
 0x56c   : > { %1010 = vadd.xlane.f32.xlu2 %v1009_v44  ;;  %v1014_v10 = vmul.f32 %v1688_v6, %v1684_v52 }
 0x56e   : > { %v1016_v16 = vpack.c.bf16 %v1014_v10, %v1014_v10 }
 0x584   : > { %1018 = vrot.lane.b32.xlu2 %v2129_v17, %s1930_s22  ;;  %v534_v17 = vld [vmem:[%s2104_s18 + $0xc] sm:$0xf] }
 0x585   : > { %v1065_v18 = vsel %vm621_vm3, %v534_v17, 0 }
 0x586   : > { %1074 = vmatpush.bf16.msrb.mxu3 %v1065_v18 }
 0x5b1   : > { %v941_v2 = vpop.f32.mrf.mxu2 }
 0x5b2   : > { %v946_v3 = vadd.f32 %v941_v2, %v2210_v20 }
 0x5b9   : > { %v943_v19 = vpop.f32.mrf.mxu2 }
 0x5ba   : > { %v947_v32 = vadd.f32 %v943_v19, %v811_v30 }
 0x5df   : > { %v1011_v5 = vpop.xlane.xlu2 %1010 }
 0x5e0   : > { %1689 = vrcp.f32 %v1011_v5 }
 0x5e1   : > { %1691 = vrcp.f32 %v1931_v39 }
 0x5e6   : > { %v1690_v7 = vpop.eup %1689 }
 0x5e7   : > { %v1015_v12 = vmul.f32 %v1690_v7, %v1686_v1  ;;  %v1019_v13 = vpop.permute.xlu2 %1018  ;;  %v1692_v40 = vpop.eup %1691 }
 0x5e8   : > { %v1024_v14 = vsel %vm621_vm3, %v1019_v13, 0  ;;  %v1095_v41 = vmul.f32 32.0, %v1692_v40  ;;  %vm1099_vm4 = vweird.f32 %v1692_v40 }
 0x5e9   : > { %v1017_v15 = vpack.c.bf16 %v1015_v12, %v1015_v12  ;;  %1033 = vmatpush.bf16.msra.mxu1 %v1024_v14  ;;  %v1139_v12 = vperm.slane %v2126_v11, 4 }
 0x5ea   : > { %v1096_v42 = vsub.f32 1.0, %v1095_v41 }
 0x5eb   : > { %1501 = vmatmul.msk.bf16.vlgmr.msra.gmra.mxu2 %vm548_vm2, %v1017_v15 }
 0x5ec   : > { %1500 = vmatmul.msk.bf16.vlgmr.msra.gmra.mxu1 %vm548_vm2, %v1016_v16  ;;  %v1097_v35 = vmul.f32 %v1692_v40, %v1096_v42  ;;  %v1142_v16 = vperm.slane %v2126_v11, 5 }
 0x669   : > { %v1035_v20 = vpop.f32.mrf.mxu1 }
 0x66e   : > { %v1056_v21 = vpop.f32.mrf.mxu2 }
 0x66f   : > { %v1060_v23 = vpack.c.bf16 %v1056_v21, %v1035_v20 }
 0x671   : > { %v1037_v24 = vpop.f32.mrf.mxu1  ;;  %1502 = vmatmul.msk.bf16.vlgmr.msrb.gmra.mxu3 %vm548_vm2, %v1060_v23 }
 0x672   : > { %v1545_v24 = vld [vmem:[%s2114_s0 + $0x18] sm:$0xff] }
 0x673   : > { %1224 = vmatpush.bf16.msrb.mxu1 %v1545_v24 }
 0x676   : > { %v1058_v25 = vpop.f32.mrf.mxu2 }
 0x677   : > { %v1544_v25 = vld [vmem:[%s2114_s0 + $0x10] sm:$0xff] }
 0x678   : > { %1225 = vmatpush.bf16.msrb.mxu1 %v1544_v25 }
 0x6f4   : > { %v1076_v27 = vpop.f32.mrf.mxu3 }
 0x6f5   : > { %v1081_v28 = vadd.f32 %v1076_v27, %v946_v3  ;;  %v1542_v27 = vld [vmem:[%s2114_s0] sm:$0xff] }
 0x6f7   : > { %v1084_v29 = vadd.f32 %v1083_v26, %v1081_v28 }
 0x6f9   : > { %v1086_v31 = vadd.f32 %v1084_v29, %v2117_v8  ;;  %v1098_v8 = vadd.f32 %v1692_v40, %v1097_v35  ;;  %v1150_v29 = vperm.slane %v2126_v11, 2 }
 0x6fb   : > { %v1088_v33 = vsel %vm511_vm1, %v1086_v31, 0.0  ;;  %v2243_v43 = vsel %vm1099_vm4, %v1692_v40, %v1098_v8 }
 0x6fc   : > { %1089 = vadd.xlane.f32.xlu1 %v1088_v33  ;;  %v1078_v34 = vpop.f32.mrf.mxu3 }
 0x6fd   : > { %v1082_v36 = vadd.f32 %v1078_v34, %v947_v32 }
 0x6ff   : > { %v1085_v37 = vadd.f32 %v1083_v26, %v1082_v36  ;;  %v1543_v26 = vld [vmem:[%s2114_s0 + $0x8] sm:$0xff] }
 0x700   : > { %1226 = vmatpush.bf16.msrb.mxu1 %v1543_v26 }
 0x701   : > { %v1087_v22 = vadd.f32 %v1085_v37, %v2119_v9  ;;  %v1191_v37 = vperm.slane %v2126_v11, 3 }
 0x703   : > { %v1091_v38 = vsel %vm511_vm1, %v1087_v22, 0.0 }
 0x704   : > { %1092 = vadd.xlane.f32.xlu0 %v1091_v38  ;;  %1227 = vmatpush.bf16.msrb.mxu1 %v1542_v27 }
 0x76f   : > { %v1090_v45 = vpop.xlane.xlu1 %1089 }
 0x770   : > { %v1101_v46 = vmul.f32 %v2243_v43, %v1090_v45 }
 0x772   : > { %v1103_v47 = vsub.f32 %v1086_v31, %v1101_v46 }
 0x774   : > { %v1105_v9 = vmul.f32 %v1103_v47, %v1103_v47 }
 0x776   : > { %v1107_v48 = vsel %vm511_vm1, %v1105_v9, 0.0 }
 0x777   : > { %1108 = vadd.xlane.f32.xlu1 %v1107_v48  ;;  %v1093_v49 = vpop.xlane.xlu0 %1092 }
 0x778   : > { %v1102_v50 = vmul.f32 %v2243_v43, %v1093_v49 }
 0x77a   : > { %v1104_v51 = vsub.f32 %v1087_v22, %v1102_v50 }
 0x77c   : > { %v1106_v52 = vmul.f32 %v1104_v51, %v1104_v51 }
 0x77e   : > { %v1110_v53 = vsel %vm511_vm1, %v1106_v52, 0.0 }
 0x77f   : > { %1111 = vadd.xlane.f32.xlu1 %v1110_v53 }
 0x7ea   : > { %v1109_v55 = vpop.xlane.xlu1 %1108 }
 0x7eb   : > { %v1113_v56 = vmul.f32 %v1109_v55, %v2243_v43 }
 0x7ed   : > { %v1115_v57 = vadd.f32 1e-05, %v1113_v56 }
 0x7ef   : > { %1693 = vrsqrt.f32 %v1115_v57  ;;  %vm1123_vm6 = vweird.f32 %v1115_v57 }
 0x7f2   : > { %v1112_v59 = vpop.xlane.xlu1 %1111 }
 0x7f3   : > { %v1114_v60 = vmul.f32 %v1112_v59, %v2243_v43 }
 0x7f5   : > { %v1694_v61 = vpop.eup %1693  ;;  %v1116_v62 = vadd.f32 1e-05, %v1114_v60 }
 0x7f6   : > { %v1118_v63 = vmul.f32 %v1694_v61, %v1115_v57  ;;  %vm1124_vm5 = vweird.f32 %v1694_v61 }
 0x7f7   : > { %1695 = vrsqrt.f32 %v1116_v62  ;;  %vm1125_vm7 = vmor %vm1123_vm6, %vm1124_vm5  ;;  %vm1133_vm9 = vweird.f32 %v1116_v62 }
 0x7f8   : > { %v1119_v0 = vmul.f32 %v1694_v61, %v1118_v63 }
 0x7fa   : > { %v1120_v1 = vmul.f32 0.5, %v1119_v0 }
 0x7fc   : > { %v1121_v44 = vsub.f32 1.5, %v1120_v1 }
 0x7fd   : > { %v1696_v2 = vpop.eup %1695 }
 0x7fe   : > { %v1122_v3 = vmul.f32 %v1694_v61, %v1121_v44  ;;  %v1128_v4 = vmul.f32 %v1696_v2, %v1116_v62  ;;  %vm1134_vm8 = vweird.f32 %v1696_v2 }
 0x7ff   : > { %vm1135_vm10 = vmor %vm1133_vm9, %vm1134_vm8 }
 0x800   : > { %v1129_v5 = vmul.f32 %v1696_v2, %v1128_v4  ;;  %v1126_v6 = vsel %vm1125_vm7, %v1694_v61, %v1122_v3  ;;  %v1280_v3 = vperm.slane %v2126_v11, 6 }
 0x801   : > { %v1137_v13 = vmul.f32 %v1126_v6, %v1103_v47  ;;  %v1283_v6 = vperm.slane %v2126_v11, 7 }
 0x802   : > { %v1130_v7 = vmul.f32 0.5, %v1129_v5 }
 0x803   : > { %v1140_v17 = vmul.f32 %v1139_v12, %v1137_v13 }
 0x804   : > { %v1131_v10 = vsub.f32 1.5, %v1130_v7 }
 0x805   : > { %v1143_v20 = vadd.f32 %v1142_v16, %v1140_v17 }
 0x806   : > { %v1132_v14 = vmul.f32 %v1696_v2, %v1131_v10 }
 0x808   : > { %v1136_v15 = vsel %vm1135_vm10, %v1696_v2, %v1132_v14 }
 0x809   : > { %v1138_v18 = vmul.f32 %v1136_v15, %v1104_v51 }
 0x80b   : > { %v1141_v19 = vmul.f32 %v1139_v12, %v1138_v18 }
 0x80d   : > { %v1144_v21 = vadd.f32 %v1142_v16, %v1141_v19 }
 0x80f   : > { %v1145_v23 = vpack.c.bf16 %v1144_v21, %v1143_v20 }
 0x811   : > { %1511 = vmatmul.msk.bf16.vlgmr.msrb.gmra.mxu0 %vm511_vm1, %v1145_v23 }
 0x88e   : > { %v1175_v28 = vpop.f32.mrf.mxu0 }
 0x88f   : > { %v1176_v30 = vadd.f32 %v1175_v28, %v1150_v29 }
 0x891   : > { %v1180_v33 = vmax.f32 %v1176_v30, 0.0 }
 0x896   : > { %v1177_v31 = vpop.f32.mrf.mxu0 }
 0x897   : > { %v1178_v32 = vadd.f32 %v1177_v31, %v1150_v29 }
 0x899   : > { %v1181_v34 = vmax.f32 %v1178_v32, 0.0 }
 0x89b   : > { %v1182_v36 = vpack.c.bf16 %v1181_v34, %v1180_v33 }
 0x89d   : > { %1528 = vmatmul.msk.bf16.vlgmr.msrb.gmra.mxu1 %vm1216_vm11, %v1182_v36 }
 0x91a   : > { %v1229_v22 = vpop.f32.mrf.mxu1 }
 0x91b   : > { %v1230_v38 = vadd.f32 %v1229_v22, %v1191_v37 }
 0x91d   : > { %v1234_v39 = vadd.f32 %v1230_v38, %v1143_v20 }
 0x91f   : > { %v1236_v40 = vsel %vm511_vm1, %v1234_v39, 0.0 }
 0x920   : > { %1237 = vadd.xlane.f32.xlu2 %v1236_v40 }
 0x922   : > { %v1231_v41 = vpop.f32.mrf.mxu1 }
 0x923   : > { %v1232_v42 = vadd.f32 %v1231_v41, %v1191_v37 }
 0x925   : > { %v1235_v35 = vadd.f32 %v1232_v42, %v1144_v21 }
 0x927   : > { %v1239_v8 = vsel %vm511_vm1, %v1235_v35, 0.0 }
 0x928   : > { %1240 = vadd.xlane.f32.xlu1 %v1239_v8 }
 0x993   : > { %v1238_v45 = vpop.xlane.xlu2 %1237 }
 0x994   : > { %v1242_v46 = vmul.f32 %v1238_v45, %v2243_v43 }
 0x996   : > { %v1244_v47 = vsub.f32 %v1234_v39, %v1242_v46 }
 0x998   : > { %v1246_v9 = vmul.f32 %v1244_v47, %v1244_v47 }
 0x99a   : > { %v1248_v48 = vsel %vm511_vm1, %v1246_v9, 0.0 }
 0x99b   : > { %v1241_v49 = vpop.xlane.xlu1 %1240  ;;  %1249 = vadd.xlane.f32.xlu1 %v1248_v48 }
 0x99c   : > { %v1243_v50 = vmul.f32 %v1241_v49, %v2243_v43 }
 0x99e   : > { %v1245_v51 = vsub.f32 %v1235_v35, %v1243_v50 }
 0x9a0   : > { %v1247_v52 = vmul.f32 %v1245_v51, %v1245_v51 }
 0x9a2   : > { %v1251_v53 = vsel %vm511_vm1, %v1247_v52, 0.0 }
 0x9a3   : > { %1252 = vadd.xlane.f32.xlu1 %v1251_v53 }
 0xa0e   : > { %v1250_v54 = vpop.xlane.xlu1 %1249 }
 0xa0f   : > { %v1254_v55 = vmul.f32 %v1250_v54, %v2243_v43 }
 0xa11   : > { %v1256_v56 = vadd.f32 1e-05, %v1254_v55 }
 0xa13   : > { %1697 = vrsqrt.f32 %v1256_v56  ;;  %vm1264_vm13 = vweird.f32 %v1256_v56 }
 0xa16   : > { %v1253_v57 = vpop.xlane.xlu1 %1252 }
 0xa17   : > { %v1255_v58 = vmul.f32 %v1253_v57, %v2243_v43 }
 0xa19   : > { %v1698_v59 = vpop.eup %1697  ;;  %v1257_v60 = vadd.f32 1e-05, %v1255_v58 }
 0xa1a   : > { %v1259_v61 = vmul.f32 %v1698_v59, %v1256_v56  ;;  %vm1265_vm12 = vweird.f32 %v1698_v59 }
 0xa1b   : > { %1699 = vrsqrt.f32 %v1257_v60  ;;  %vm1266_vm14 = vmor %vm1264_vm13, %vm1265_vm12  ;;  %vm1274_vm0 = vweird.f32 %v1257_v60 }
 0xa1c   : > { %v1260_v62 = vmul.f32 %v1698_v59, %v1259_v61 }
 0xa1e   : > { %v1261_v63 = vmul.f32 0.5, %v1260_v62 }
 0xa20   : > { %v1262_v0 = vsub.f32 1.5, %v1261_v63 }
 0xa21   : > { %v1700_v1 = vpop.eup %1699 }
 0xa22   : > { %v1263_v44 = vmul.f32 %v1698_v59, %v1262_v0  ;;  %v1269_v2 = vmul.f32 %v1700_v1, %v1257_v60  ;;  %vm1275_vm15 = vweird.f32 %v1700_v1 }
 0xa23   : > { %vm1276_vm2 = vmor %vm1274_vm0, %vm1275_vm15 }
 0xa24   : > { %v1267_v4 = vsel %vm1266_vm14, %v1698_v59, %v1263_v44  ;;  %v1270_v5 = vmul.f32 %v1700_v1, %v1269_v2 }
 0xa25   : > { %v1278_v43 = vmul.f32 %v1267_v4, %v1244_v47 }
 0xa26   : > { %v1271_v7 = vmul.f32 0.5, %v1270_v5 }
 0xa27   : > { %v1281_v10 = vmul.f32 %v1280_v3, %v1278_v43 }
 0xa28   : > { %v1272_v12 = vsub.f32 1.5, %v1271_v7 }
 0xa29   : > { %v1284_v13 = vadd.f32 %v1283_v6, %v1281_v10 }
 0xa2a   : > { %v1273_v14 = vmul.f32 %v1700_v1, %v1272_v12 }
 0xa2b   : > { %1286 = vst.msk [vmem:[#allocation2] sm:$0xff] %vm511_vm1, %v1284_v13 }
 0xa2c   : > { %v1277_v15 = vsel %vm1276_vm2, %v1700_v1, %v1273_v14 }
 0xa2d   : > { %v1279_v16 = vmul.f32 %v1277_v15, %v1245_v51 }
 0xa2f   : > { %v1282_v17 = vmul.f32 %v1280_v3, %v1279_v16  ;;  %1291 = sbr.rel (%p1529_p3) target bundleno = 2614 (0xa36), region = 76 }
 0xa31   : > { %v1285_v18 = vadd.f32 %v1283_v6, %v1282_v17 }
 0xa33   : > { %1287 = vst.msk [vmem:[#allocation2 + $0x8] sm:$0xff] %vm511_vm1, %v1285_v18 }
 0xa34   : > { %1292 = vst.msk [vmem:[#allocation11] sm:$0xff] %vm511_vm1, %v1284_v13 }
 0xa35   : > { %1293 = vst.msk [vmem:[#allocation11 + $0x8] sm:$0xff] %vm511_vm1, %v1285_v18 }
 0xa36 PF: > { %s2318_s0 = sadd.s32 4294967295, %s1911_s10   ;;  %s1304_s11 = sshll.u32 %s2308_s8, 4  ;;  %s1305_s11 = int_to_ptr.hbm [resolvable:$true] %s1304_s11 }
 0xa37   : > { %p1585_p4 = scmp.eq.s32.totalorder %s2318_s0, 1  ;;  %s1932_s16 = smov [#allocation11]  }
 0xa38   : > { %s1302_s26 = sshll.u32 %s1932_s16, 4  ;;  %s1933_s13 = smov 128   ;;  %s1303_s26 = int_to_ptr.vmem [resolvable:$true] %s1302_s26 }
 0xa39   : > { %s1934_s24 = smov 8  }
 0xa3a   : > { %1561 = dma.vmem_to_hbm [thread:$0]  (%p1585_p4), %s1303_s26, 256, %s1305_s11, [#allocation5], %s1933_s13, %s1933_s13, %s1934_s24  }
 0xa3b   : > { %1886 = dma.done.wait (%p1585_p4), [#allocation5], 256  }
 0xa3c   : > { %1888 = vsyncadd (%p1585_p4), [#allocation5], 4294967040 }
 0xa3d PF: > { %s24_s10 = sadd.s32 1, %s1911_s10   ;;  %s2319_s27 = smov %s1895_s28 }
 0xa3e   : > { %p21_p5 = scmp.ge.s32.totalorder %s24_s10, 4   ;;  %s2320_s28 = smov %s1899_s29 }
 0xa3f   : > { %s2321_s29 = smov %s2070_s14  ;;  %s2322_s30 = smov %s1907_s9 }
 0xa40   : > { %s2323_s9 = smov %s2325_s25  ;;  %23 = sbr.rel (!%p21_p5) target bundleno = 9 (0x9), region = 125 }
 0xa45   :  { %1321 = vsyncpa [#allocation4], 1 }
 0xa46   :  { %1323 = vsyncpa [#allocation4 + $0x1], 1 }
 0xa47   :  { %1324 = vsyncpa [#allocation7], 1 }
 0xa48   :  { %1325 = vsyncpa [#allocation10], 1 }
 0xa49   :  { %1327 = vsyncpa [#allocation10 + $0x1], 1 }
 0xa4a   :  { %1328 = vsyncpa [#allocation5], 1 }
 0xa4b   :  { %1330 = vsyncpa [#allocation5 + $0x1], 1 }

</bundles_post_ra>
